<compile_context>
chip_gen: v6e
topology: v6e:2x2x1
jax: 0.10.0
libtpu: 0.0.40
codegen_flags: <defaults>
</compile_context>

<pallas_src>
import jax
import jax.numpy as jnp
from jax.experimental import pallas as pl
from jax.experimental.pallas import tpu as pltpu


def _head_kernel(x_ref, w1_ref, b1_ref, w2_ref, b2_ref, o_ref):
    # x: [TM, E], w1: [E, M], b1: [1, M], w2: [1, M], b2: [1, 1] -> o: [1, TM]
    x = x_ref[...]
    # fc1 on the MXU with f32 accumulation; bias broadcast along lanes.
    h = jnp.dot(x, w1_ref[...], preferred_element_type=jnp.float32) + b1_ref[...]
    # jax.nn.sigmoid lowers to the EUP logistic op (EUP slot is otherwise idle).
    h = jax.nn.sigmoid(h)                               # F.sigmoid(self.fc1(x)), [TM, M] f32
    # fc2 (mid -> 1) as a single MXU dot producing the lane-dense row directly:
    # contract the mid dim of w2_row [1, M] against the mid dim of h [TM, M] -> [1, TM].
    z = jax.lax.dot_general(
        w2_ref[...], h,
        dimension_numbers=(((1,), (1,)), ((), ())),
        preferred_element_type=jnp.float32,
    ) + b2_ref[...]                                     # [1, TM]
    o_ref[...] = jax.nn.sigmoid(z).astype(o_ref.dtype)  # F.sigmoid(self.fc2(...))


def _round_up(x, m):
    return ((x + m - 1) // m) * m


def _choose_tm(n, cap):
    """Pick a lane-aligned batch tile: big (amortize per-step overhead), but
    keep >= 2 grid steps when possible so v7x's two TensorCores both work."""
    n128 = _round_up(n, 128)
    if n128 <= 256:
        return n128                       # tiny batch: a single small tile
    half = _round_up((n + 1) // 2, 128)   # split into (at least) two tiles
    return max(128, min(cap, half))


def path_predicter_head(x, w1, b1, w2, b2, *, tm_cap=8192):
    """Fused sigmoid(fc2(sigmoid(fc1(x)))) head of PathPredicter.

    x : [N, emb_size]  (float32 or bfloat16, as produced by the backbone)
    w1: [emb_size, mid_size], b1: [mid_size]
    w2: [mid_size, 1],        b2: [1]
    returns [N, 1] float32
    """
    n, emb = x.shape
    mid, tgt = w2.shape
    assert w1.shape == (emb, mid)
    assert tgt == 1, "PathPredicter uses target_size=1 (lane-dense output relies on it)"

    tm = _choose_tm(n, tm_cap)
    num_tiles = int(pl.cdiv(n, tm))
    n_pad = num_tiles * tm                # no jnp.pad: Pallas handles the ragged tail block

    # Tiny params: match w1 to x's dtype (MXU bf16 path when x is bf16); keep the
    # rest of the math in f32.
    w1_m = w1.astype(x.dtype) if w1.dtype != x.dtype else w1
    b1_2d = b1.reshape(1, mid).astype(jnp.float32)
    w2_row = w2.reshape(1, mid).astype(jnp.float32)
    b2_2d = b2.reshape(1, 1).astype(jnp.float32)

    out = pl.pallas_call(
        _head_kernel,
        out_shape=jax.ShapeDtypeStruct((1, n_pad), jnp.float32),
        grid=(num_tiles,),
        in_specs=[
            pl.BlockSpec((tm, emb), lambda i: (i, 0)),    # x: streamed per batch tile
            pl.BlockSpec((emb, mid), lambda i: (0, 0)),   # W1: resident
            pl.BlockSpec((1, mid), lambda i: (0, 0)),     # b1: resident
            pl.BlockSpec((1, mid), lambda i: (0, 0)),     # W2 row: resident
            pl.BlockSpec((1, 1), lambda i: (0, 0)),       # b2: resident
        ],
        out_specs=pl.BlockSpec((1, tm), lambda i: (0, i)),  # lane-dense TM-wide stores
        compiler_params=pltpu.CompilerParams(
            dimension_semantics=("parallel",)),             # megacore split on v7x
    )(x, w1_m, b1_2d, w2_row, b2_2d)

    # (1, n_pad) lane-dense row -> logical (N, 1); rows >= N (ragged tail) dropped.
    return out.reshape(n_pad, 1)[:n]


if __name__ == "__main__":
    EMB_SIZE, MID_SIZE, TARGET_SIZE = 64, 32, 1
    BATCH = 1200   # not a tile multiple: exercises the multi-step grid + ragged-tail path

    key = jax.random.PRNGKey(0)
    kx, kw1, kb1, kw2, kb2 = jax.random.split(key, 5)

    # Deterministic stand-in for the MMPath backbone output embedding `x`.
    x = jax.random.normal(kx, (BATCH, EMB_SIZE), dtype=jnp.float32)

    # Deterministic parameter init (nn.Linear-style uniform bounds).
    bound1 = 1.0 / (EMB_SIZE ** 0.5)
    w1 = jax.random.uniform(kw1, (EMB_SIZE, MID_SIZE), jnp.float32, -bound1, bound1)
    b1 = jax.random.uniform(kb1, (MID_SIZE,), jnp.float32, -bound1, bound1)
    bound2 = 1.0 / (MID_SIZE ** 0.5)
    w2 = jax.random.uniform(kw2, (MID_SIZE, TARGET_SIZE), jnp.float32, -bound2, bound2)
    b2 = jax.random.uniform(kb2, (TARGET_SIZE,), jnp.float32, -bound2, bound2)

    out = path_predicter_head(x, w1, b1, w2, b2)
    out = jax.block_until_ready(out)

    # Pure-JAX reference check of the head math.
    ref = jax.nn.sigmoid(jax.nn.sigmoid(x @ w1 + b1) @ w2 + b2)
    assert out.shape == (BATCH, TARGET_SIZE)
    assert jnp.allclose(out, ref, atol=1e-5, rtol=1e-5), \
        float(jnp.max(jnp.abs(out - ref)))

    print("KERNEL_OK")
</pallas_src>

<mosaic_0001>
module attributes {stable_mosaic.version = 11 : i64} {
  func.func @_head_kernel(%arg0: i32, %arg1: memref<640x64xf32, #tpu.memory_space<vmem>>, %arg2: memref<64x32xf32, #tpu.memory_space<vmem>>, %arg3: memref<1x32xf32, #tpu.memory_space<vmem>>, %arg4: memref<1x32xf32, #tpu.memory_space<vmem>>, %arg5: memref<1x1xf32, #tpu.memory_space<vmem>>, %arg6: memref<1x640xf32, #tpu.memory_space<vmem>>) attributes {dimension_semantics = [#tpu.dimension_semantics<parallel>], iteration_bounds = array<i64: 2>, scalar_prefetch = 0 : i64, scratch_operands = 0 : i64, tpu.core_type = #tpu.core_type<tc>, window_params = [{transform_indices = @transform_0, window_bounds = array<i64: 640, 64>}, {pipeline_mode = #tpu.pipeline_mode<synchronous>, transform_indices = @transform_1, window_bounds = array<i64: 64, 32>}, {pipeline_mode = #tpu.pipeline_mode<synchronous>, transform_indices = @transform_2, window_bounds = array<i64: 1, 32>}, {pipeline_mode = #tpu.pipeline_mode<synchronous>, transform_indices = @transform_3, window_bounds = array<i64: 1, 32>}, {pipeline_mode = #tpu.pipeline_mode<synchronous>, transform_indices = @transform_4, window_bounds = array<i64: 1, 1>}, {transform_indices = @transform_5, window_bounds = array<i64: 1, 640>}]} {
    %c0 = arith.constant 0 : index
    %c0_0 = arith.constant 0 : index
    %0 = vector.load %arg1[%c0, %c0_0] : memref<640x64xf32, #tpu.memory_space<vmem>>, vector<640x64xf32>
    %c0_1 = arith.constant 0 : index
    %c0_2 = arith.constant 0 : index
    %1 = vector.load %arg2[%c0_1, %c0_2] : memref<64x32xf32, #tpu.memory_space<vmem>>, vector<64x32xf32>
    %cst = arith.constant dense<0.000000e+00> : vector<640x32xf32>
    %2 = tpu.matmul %0, %1, %cst {dimension_numbers = #tpu.dot_dimension_numbers<[1], [0], [0], [1], [0, 0, 1, 1], [], []>} : vector<640x64xf32>, vector<64x32xf32>, vector<640x32xf32> -> vector<640x32xf32>
    %c0_3 = arith.constant 0 : index
    %c0_4 = arith.constant 0 : index
    %3 = vector.load %arg3[%c0_3, %c0_4] : memref<1x32xf32, #tpu.memory_space<vmem>>, vector<1x32xf32>
    %4 = vector.broadcast %3 : vector<1x32xf32> to vector<640x32xf32>
    %5 = arith.addf %2, %4 : vector<640x32xf32>
    %6 = arith.negf %5 : vector<640x32xf32>
    %7 = math.exp %6 : vector<640x32xf32>
    %cst_5 = arith.constant 1.000000e+00 : f32
    %8 = vector.broadcast %cst_5 : f32 to vector<640x32xf32>
    %9 = arith.addf %8, %7 : vector<640x32xf32>
    %10 = arith.divf %8, %9 : vector<640x32xf32>
    %c0_6 = arith.constant 0 : index
    %c0_7 = arith.constant 0 : index
    %11 = vector.load %arg4[%c0_6, %c0_7] : memref<1x32xf32, #tpu.memory_space<vmem>>, vector<1x32xf32>
    %cst_8 = arith.constant dense<0.000000e+00> : vector<1x640xf32>
    %12 = tpu.matmul %11, %10, %cst_8 {dimension_numbers = #tpu.dot_dimension_numbers<[1], [1], [0], [0], [0, 0, 1, 0], [], []>} : vector<1x32xf32>, vector<640x32xf32>, vector<1x640xf32> -> vector<1x640xf32>
    %c0_9 = arith.constant 0 : index
    %c0_10 = arith.constant 0 : index
    %13 = vector.load %arg5[%c0_9, %c0_10] : memref<1x1xf32, #tpu.memory_space<vmem>>, vector<1x1xf32>
    %14 = vector.broadcast %13 : vector<1x1xf32> to vector<1x640xf32>
    %15 = arith.addf %12, %14 : vector<1x640xf32>
    %16 = arith.negf %15 : vector<1x640xf32>
    %17 = math.exp %16 : vector<1x640xf32>
    %cst_11 = arith.constant 1.000000e+00 : f32
    %18 = vector.broadcast %cst_11 : f32 to vector<1x640xf32>
    %19 = arith.addf %18, %17 : vector<1x640xf32>
    %20 = arith.divf %18, %19 : vector<1x640xf32>
    %c0_12 = arith.constant 0 : index
    %c0_13 = arith.constant 0 : index
    %21 = vector.load %arg6[%c0_12, %c0_13] : memref<1x640xf32, #tpu.memory_space<vmem>>, vector<1x640xf32>
    tpu.vector_store %arg6[%c0_12, %c0_13], %20 {strides = array<i32>} : memref<1x640xf32, #tpu.memory_space<vmem>>, vector<1x640xf32>,
    return
  }
  func.func @transform_0(%arg0: i32) -> (i32, i32) {
    %c0_i32 = arith.constant 0 : i32
    %c0_i32_0 = arith.constant 0 : i32
    return %arg0, %c0_i32 : i32, i32
  }
  func.func @transform_1(%arg0: i32) -> (i32, i32) {
    %c0_i32 = arith.constant 0 : i32
    %c0_i32_0 = arith.constant 0 : i32
    %c0_i32_1 = arith.constant 0 : i32
    return %c0_i32, %c0_i32_0 : i32, i32
  }
  func.func @transform_2(%arg0: i32) -> (i32, i32) {
    %c0_i32 = arith.constant 0 : i32
    %c0_i32_0 = arith.constant 0 : i32
    %c0_i32_1 = arith.constant 0 : i32
    return %c0_i32, %c0_i32_0 : i32, i32
  }
  func.func @transform_3(%arg0: i32) -> (i32, i32) {
    %c0_i32 = arith.constant 0 : i32
    %c0_i32_0 = arith.constant 0 : i32
    %c0_i32_1 = arith.constant 0 : i32
    return %c0_i32, %c0_i32_0 : i32, i32
  }
  func.func @transform_4(%arg0: i32) -> (i32, i32) {
    %c0_i32 = arith.constant 0 : i32
    %c0_i32_0 = arith.constant 0 : i32
    %c0_i32_1 = arith.constant 0 : i32
    return %c0_i32, %c0_i32_0 : i32, i32
  }
  func.func @transform_5(%arg0: i32) -> (i32, i32) {
    %c0_i32 = arith.constant 0 : i32
    %c0_i32_0 = arith.constant 0 : i32
    return %c0_i32, %arg0 : i32, i32
  }
}

</mosaic_0001>

<bundles_post_ra>
// kernel: tpu_custom_call.1
= control target key start
LH: loop header
LB: loop body
LE: loop exit
PB: predicated region body
PF: predicated region fallthrough
CT: control target
= control target key end

     0   :  { %s3945_s0 = inlined_call_operand.vmem [shape: f32[1200,64], index: 0, kind: input, shape index: {}]   ;;  %s3946_s1 = inlined_call_operand.vmem [shape: f32[64,32], index: 1, kind: input, shape index: {}]   ;;  %s3947_s2 = inlined_call_operand.vmem [shape: f32[1,32], index: 2, kind: input, shape index: {}]   ;;  %s3948_s3 = inlined_call_operand.vmem [shape: f32[1,32], index: 3, kind: input, shape index: {}]   ;;  %s3949_s4 = inlined_call_operand.<no memory space> [shape: f32[1,1], index: 4, kind: input, shape index: {}]   ;;  %s3950_s5 = inlined_call_operand.hbm [shape: f32[1,1280], index: 5, kind: output, shape index: {}]  }
   0x1   :  { %v10_v0 = vstv %s3949_s4 }
   0x2   :  { %11 = vst [vmem:[#allocation2] sm:$0x1] %v10_v0 }
   0x3   :  { %12 = vsyncpa [#allocation4], 0 }
   0x4   :  { %14 = vsyncpa [#allocation4 + $0x1], 0  ;;  %s3239_s20 = smov 0   ;;  %s3241_s21 = smov 0  }
   0x5   :  { %s3243_s22 = smov 0   ;;  %s3245_s23 = smov 0  }
   0x6 LB: > { %s2149_s4 = sadd.s32 4294967295, %s3199_s23   ;;  %s2150_s24 = sadd.s32 4294967294, %s3199_s23   ;;  %s3199_s23 = sphi %s3245_s23, %s3956_s23   ;;  %s3195_s22 = sphi %s3243_s22, %s3955_s22   ;;  %s3191_s21 = sphi %s3241_s21, %s3954_s21   ;;  %s3187_s20 = sphi %s3239_s20, %s3953_s20  }
   0x7   : > { %s3262_s25 = sadd.s32 1, %s3199_s23   ;;  %s137_s26 = sadd.s32 1, %s3195_s22 }
   0x8   : > { %s134_s27 = ssub.s32 %s3199_s23, %s3262_s25  ;;  %p147_p0 = scmp.ne.s32.totalorder %s3195_s22, %s3191_s21 }
   0x9   : > { %p135_p1 = scmp.eq.s32.totalorder %s134_s27, 0  ;;  %p148_p2 = scmp.eq.s32.totalorder %s2149_s4, 1 }
   0xa   : > { %p153_p3 = scmp.ne.s32.totalorder %s3191_s21, %s3187_s20  ;;  %p154_p4 = scmp.eq.s32.totalorder %s2150_s24, 1 }
   0xb   : > { %s3272_s28 = scalar_select %p135_p1, %s3195_s22, %s137_s26  }
   0xc   : > { %p3274_p5 = por %p148_p2, %p147_p0  ;;  %p3278_p6 = por %p154_p4, %p153_p3 }
   0xd   : > { %p2153_p7 = scmp.ge.s32.totalorder %s3199_s23, 1  ;;  %p201_p8 = scmp.lt.s32.totalorder %s3199_s23, 3 }
   0xf   : > { %p202_p9 = pnand %p2153_p7, %p201_p8 }
  0x10   : > { %s3290_s10 = smul.u32 (!%p202_p9), 80, %s2149_s4  ;;  %s230_s19 = sand.u32 (!%p202_p9), 1, %s3191_s21  }
  0x11   : > { %205 = sbr.rel (%p202_p9) target bundleno = 731 (0x2db), region = 40  ;;  %s2077_s8 = scalar_lea.sflag (!%p202_p9), [#allocation4], %s230_s19 }
  0x12   : > { %p238_p10 = scmp.lt.s32.totalorder (!%p202_p9), %s3290_s10, 149  ;;  %s2752_s4 = smul.u32 (!%p202_p9), 5, %s230_s19 }
  0x13   : > { %s2089_s7 = scalar_lea.hbm (!%p202_p9), %s3950_s5, %s3290_s10  ;;  %s3205_s11 = smov (!%p202_p9), [#allocation3]  }
  0x14   : > { %s3143_s12 = sshll.u32 (!%p202_p9), %s3205_s11, 4  ;;  %s3144_s12 = int_to_ptr.vmem [resolvable:$false] %s3143_s12 }
  0x15   : > { %s3145_s13 = scalar_lea.vmem (!%p202_p9), %s3144_s12, 160 }
  0x16   : > { %v335_v1 = vld [vmem:[%s3946_s1 + $0x38] sm:$0xff]  ;;  %v334_v2 = vld [vmem:[%s3946_s1 + $0x30] sm:$0xff]  ;;  %v333_v3 = vld [vmem:[%s3946_s1 + $0x28] sm:$0xff]  ;;  %s239_s15 = scalar_select %p238_p10, %s3290_s10, 149  ;;  %vm343_vm0 = vcmask 523264   ;;  %vm1540_vm1 = vcmask 261120  }
  0x17   : > { %2581 = vmatprep.subr.mxu0 %v335_v1  ;;  %v332_v4 = vld [vmem:[%s3946_s1 + $0x20] sm:$0xff]  ;;  %v331_v5 = vld [vmem:[%s3946_s1 + $0x18] sm:$0xff]  ;;  %v330_v6 = vld [vmem:[%s3946_s1 + $0x10] sm:$0xff]  ;;  %vm3202_vm2 = vmmov 0  }
  0x18   : > { %2582 = vmatpush3.msra.mxu0 %v335_v1  ;;  %s2154_s18 = sshll.u32 %s239_s15, 3  ;;  %v329_v8 = vld [vmem:[%s3946_s1 + $0x8] sm:$0xff]  ;;  %v328_v9 = vld [vmem:[%s3946_s1] sm:$0xff] }
  0x19   : > { %2583 = vmatprep.subr.mxu0 %v334_v2  ;;  %s3306_s24 = scalar_lea.vmem %s3945_s0, %s2154_s18 }
  0x1a   : > { %2584 = vmatpush3.msra.mxu0 %v334_v2  ;;  %v248_v7 = vld [vmem:[%s3306_s24] sm:$0xff]  ;;  %v249_v10 = vld [vmem:[%s3306_s24 + $0x8] sm:$0xff]  ;;  %v250_v11 = vld [vmem:[%s3306_s24 + $0x10] sm:$0xff] }
  0x1b   : > { %2585 = vmatprep.subr.mxu0 %v333_v3  ;;  %2597 = vmatprep.mubr.msk.f32.mxu0 %vm343_vm0, %v248_v7  ;;  %v251_v12 = vld [vmem:[%s3306_s24 + $0x18] sm:$0xff]  ;;  %v252_v13 = vld [vmem:[%s3306_s24 + $0x20] sm:$0xff]  ;;  %v253_v14 = vld [vmem:[%s3306_s24 + $0x28] sm:$0xff] }
  0x1c   : > { %2586 = vmatpush3.msra.mxu0 %v333_v3  ;;  %v254_v15 = vld [vmem:[%s3306_s24 + $0x30] sm:$0xff]  ;;  %v255_v16 = vld [vmem:[%s3306_s24 + $0x38] sm:$0xff]  ;;  %v256_v17 = vld [vmem:[%s3306_s24 + $0x40] sm:$0xff] }
  0x1d   : > { %2587 = vmatprep.subr.mxu0 %v332_v4  ;;  %v257_v18 = vld [vmem:[%s3306_s24 + $0x48] sm:$0xff]  ;;  %v258_v19 = vld [vmem:[%s3306_s24 + $0x50] sm:$0xff]  ;;  %v259_v20 = vld [vmem:[%s3306_s24 + $0x58] sm:$0xff] }
  0x1e   : > { %2588 = vmatpush3.msra.mxu0 %v332_v4  ;;  %v260_v21 = vld [vmem:[%s3306_s24 + $0x60] sm:$0xff]  ;;  %v261_v22 = vld [vmem:[%s3306_s24 + $0x68] sm:$0xff]  ;;  %v262_v23 = vld [vmem:[%s3306_s24 + $0x70] sm:$0xff] }
  0x1f   : > { %2589 = vmatprep.subr.mxu0 %v331_v5  ;;  %v263_v24 = vld [vmem:[%s3306_s24 + $0x78] sm:$0xff]  ;;  %v264_v25 = vld [vmem:[%s3306_s24 + $0x80] sm:$0xff]  ;;  %v265_v26 = vld [vmem:[%s3306_s24 + $0x88] sm:$0xff] }
  0x20   : > { %2590 = vmatpush3.msra.mxu0 %v331_v5  ;;  %v266_v27 = vld [vmem:[%s3306_s24 + $0x90] sm:$0xff]  ;;  %v267_v28 = vld [vmem:[%s3306_s24 + $0x98] sm:$0xff]  ;;  %v268_v29 = vld [vmem:[%s3306_s24 + $0xa0] sm:$0xff] }
  0x21   : > { %2591 = vmatprep.subr.mxu0 %v330_v6  ;;  %v269_v30 = vld [vmem:[%s3306_s24 + $0xa8] sm:$0xff]  ;;  %v270_v31 = vld [vmem:[%s3306_s24 + $0xb0] sm:$0xff]  ;;  %v271_v32 = vld [vmem:[%s3306_s24 + $0xb8] sm:$0xff] }
  0x22   : > { %2592 = vmatpush3.msra.mxu0 %v330_v6  ;;  %v272_v33 = vld [vmem:[%s3306_s24 + $0xc0] sm:$0xff]  ;;  %v273_v34 = vld [vmem:[%s3306_s24 + $0xc8] sm:$0xff]  ;;  %v274_v35 = vld [vmem:[%s3306_s24 + $0xd0] sm:$0xff] }
  0x23   : > { %2593 = vmatprep.subr.mxu0 %v329_v8  ;;  %v275_v36 = vld [vmem:[%s3306_s24 + $0xd8] sm:$0xff]  ;;  %v276_v37 = vld [vmem:[%s3306_s24 + $0xe0] sm:$0xff]  ;;  %v277_v38 = vld [vmem:[%s3306_s24 + $0xe8] sm:$0xff] }
  0x24   : > { %2594 = vmatpush3.msra.mxu0 %v329_v8  ;;  %v278_v39 = vld [vmem:[%s3306_s24 + $0xf0] sm:$0xff]  ;;  %v279_v40 = vld [vmem:[%s3306_s24 + $0xf8] sm:$0xff]  ;;  %v280_v41 = vld [vmem:[%s3306_s24 + $0x100] sm:$0xff] }
  0x25   : > { %2595 = vmatprep.subr.mxu0 %v328_v9  ;;  %v281_v42 = vld [vmem:[%s3306_s24 + $0x108] sm:$0xff]  ;;  %v282_v43 = vld [vmem:[%s3306_s24 + $0x110] sm:$0xff]  ;;  %v283_v44 = vld [vmem:[%s3306_s24 + $0x118] sm:$0xff] }
  0x26   : > { %2596 = vmatpush3.msra.mxu0 %v328_v9  ;;  %v284_v45 = vld [vmem:[%s3306_s24 + $0x120] sm:$0xff]  ;;  %v285_v46 = vld [vmem:[%s3306_s24 + $0x128] sm:$0xff]  ;;  %v286_v47 = vld [vmem:[%s3306_s24 + $0x130] sm:$0xff] }
  0x27   : > { %2598 = vmatmul.mubr.msk.f32.vlgmr.msra.gmra.mxu0 %vm343_vm0, %v249_v10  ;;  %v287_v48 = vld [vmem:[%s3306_s24 + $0x138] sm:$0xff]  ;;  %v288_v49 = vld [vmem:[%s3306_s24 + $0x140] sm:$0xff]  ;;  %v289_v50 = vld [vmem:[%s3306_s24 + $0x148] sm:$0xff] }
  0x28   : > { %2600 = vmatprep.mubr.msk.f32.mxu0 %vm343_vm0, %v250_v11  ;;  %v290_v51 = vld [vmem:[%s3306_s24 + $0x150] sm:$0xff]  ;;  %v291_v52 = vld [vmem:[%s3306_s24 + $0x158] sm:$0xff]  ;;  %v292_v53 = vld [vmem:[%s3306_s24 + $0x160] sm:$0xff] }
  0x29   : > { %v293_v54 = vld [vmem:[%s3306_s24 + $0x168] sm:$0xff]  ;;  %v294_v55 = vld [vmem:[%s3306_s24 + $0x170] sm:$0xff]  ;;  %v295_v56 = vld [vmem:[%s3306_s24 + $0x178] sm:$0xff] }
  0x2a   : > { %v296_v57 = vld [vmem:[%s3306_s24 + $0x180] sm:$0xff]  ;;  %v297_v58 = vld [vmem:[%s3306_s24 + $0x188] sm:$0xff]  ;;  %v298_v59 = vld [vmem:[%s3306_s24 + $0x190] sm:$0xff] }
  0x2b   : > { %2601 = vmatmul.mubr.msk.f32.gmra.mxu0 %vm343_vm0, %v251_v12  ;;  %v299_v60 = vld [vmem:[%s3306_s24 + $0x198] sm:$0xff]  ;;  %v300_v61 = vld [vmem:[%s3306_s24 + $0x1a0] sm:$0xff]  ;;  %v301_v62 = vld [vmem:[%s3306_s24 + $0x1a8] sm:$0xff] }
  0x2c   : > { %2603 = vmatprep.mubr.msk.f32.mxu0 %vm343_vm0, %v252_v13  ;;  %v302_v63 = vld [vmem:[%s3306_s24 + $0x1b0] sm:$0xff]  ;;  %v303_v0 = vld [vmem:[%s3306_s24 + $0x1b8] sm:$0xff]  ;;  %v304_v1 = vld [vmem:[%s3306_s24 + $0x1c0] sm:$0xff] }
  0x2d   : > { %v305_v2 = vld [vmem:[%s3306_s24 + $0x1c8] sm:$0xff]  ;;  %v306_v3 = vld [vmem:[%s3306_s24 + $0x1d0] sm:$0xff]  ;;  %v307_v4 = vld [vmem:[%s3306_s24 + $0x1d8] sm:$0xff] }
  0x2e   : > { %v308_v5 = vld [vmem:[%s3306_s24 + $0x1e0] sm:$0xff]  ;;  %v309_v6 = vld [vmem:[%s3306_s24 + $0x1e8] sm:$0xff]  ;;  %v310_v7 = vld [vmem:[%s3306_s24 + $0x1f0] sm:$0xff] }
  0x2f   : > { %2604 = vmatmul.mubr.msk.f32.gmra.mxu0 %vm343_vm0, %v253_v14  ;;  %v311_v8 = vld [vmem:[%s3306_s24 + $0x1f8] sm:$0xff]  ;;  %v312_v9 = vld [vmem:[%s3306_s24 + $0x200] sm:$0xff]  ;;  %v313_v10 = vld [vmem:[%s3306_s24 + $0x208] sm:$0xff] }
  0x30   : > { %2606 = vmatprep.mubr.msk.f32.mxu0 %vm343_vm0, %v254_v15  ;;  %v314_v11 = vld [vmem:[%s3306_s24 + $0x210] sm:$0xff]  ;;  %v315_v12 = vld [vmem:[%s3306_s24 + $0x218] sm:$0xff]  ;;  %v316_v13 = vld [vmem:[%s3306_s24 + $0x220] sm:$0xff] }
  0x31   : > { %v317_v14 = vld [vmem:[%s3306_s24 + $0x228] sm:$0xff]  ;;  %v318_v15 = vld [vmem:[%s3306_s24 + $0x230] sm:$0xff] }
  0x33   : > { %2607 = vmatmul.mubr.msk.f32.gmra.mxu0 %vm343_vm0, %v255_v16  ;;  %v319_v16 = vld [vmem:[%s3306_s24 + $0x238] sm:$0xff] }
  0x34   : > { %2609 = vmatprep.mubr.msk.f32.mxu0 %vm343_vm0, %v256_v17  ;;  %v320_v17 = vld [vmem:[%s3306_s24 + $0x240] sm:$0xff] }
  0x37   : > { %2610 = vmatmul.mubr.msk.f32.gmra.mxu0 %vm343_vm0, %v257_v18  ;;  %v321_v18 = vld [vmem:[%s3306_s24 + $0x248] sm:$0xff] }
  0x38   : > { %2612 = vmatprep.mubr.msk.f32.mxu0 %vm343_vm0, %v258_v19  ;;  %v322_v19 = vld [vmem:[%s3306_s24 + $0x250] sm:$0xff] }
  0x3b   : > { %2613 = vmatmul.mubr.msk.f32.gmra.mxu0 %vm343_vm0, %v259_v20  ;;  %v323_v20 = vld [vmem:[%s3306_s24 + $0x258] sm:$0xff] }
  0x3c   : > { %2615 = vmatprep.mubr.msk.f32.mxu0 %vm343_vm0, %v260_v21  ;;  %v324_v21 = vld [vmem:[%s3306_s24 + $0x260] sm:$0xff] }
  0x3f   : > { %2616 = vmatmul.mubr.msk.f32.gmra.mxu0 %vm343_vm0, %v261_v22  ;;  %v325_v22 = vld [vmem:[%s3306_s24 + $0x268] sm:$0xff] }
  0x40   : > { %2618 = vmatprep.mubr.msk.f32.mxu0 %vm343_vm0, %v262_v23  ;;  %v326_v23 = vld [vmem:[%s3306_s24 + $0x270] sm:$0xff] }
  0x43   : > { %2619 = vmatmul.mubr.msk.f32.gmra.mxu0 %vm343_vm0, %v263_v24  ;;  %v327_v24 = vld [vmem:[%s3306_s24 + $0x278] sm:$0xff]  ;;  %s232_s24 = scalar_lea.vmem [#allocation3], %s2752_s4 }
  0x44   : > { %2621 = vmatprep.mubr.msk.f32.mxu0 %vm343_vm0, %v264_v25  ;;  %s2091_s26 = sshll.u32 %s232_s24, 4  ;;  %s2092_s26 = int_to_ptr.vmem [resolvable:$true] %s2091_s26 }
  0x45   : > { %s3139_s9 = scalar_lea.vmem %s2092_s26, 80  ;;  %p3146_p0 = scmp.lt.s32.totalorder %s2092_s26, %s3144_s12 }
  0x46   : > { %p3140_p11 = scmp.ne.s32.totalorder %s2092_s26, %s3139_s9  ;;  %p3147_p1 = scmp.lt.s32.totalorder %s3145_s13, %s3139_s9 }
  0x47   : > { %2622 = vmatmul.mubr.msk.f32.gmra.mxu0 %vm343_vm0, %v265_v26 }
  0x48   : > { %2624 = vmatprep.mubr.msk.f32.mxu0 %vm343_vm0, %v266_v27  ;;  %p3141_p12 = pnand %p3140_p11, %p3274_p5  ;;  %p3148_p2 = por %p3147_p1, %p3146_p0 }
  0x4a   : > { %p3142_p13 = pneg %p3141_p12 }
  0x4b   : > { %2625 = vmatmul.mubr.msk.f32.gmra.mxu0 %vm343_vm0, %v267_v28 }
  0x4c   : > { %2627 = vmatprep.mubr.msk.f32.mxu0 %vm343_vm0, %v268_v29  ;;  %p3149_p3 = pnand %p3148_p2, %p3142_p13 }
  0x4f   : > { %2628 = vmatmul.mubr.msk.f32.gmra.mxu0 %vm343_vm0, %v269_v30 }
  0x50   : > { %2630 = vmatprep.mubr.msk.f32.mxu0 %vm343_vm0, %v270_v31 }
  0x53   : > { %2631 = vmatmul.mubr.msk.f32.gmra.mxu0 %vm343_vm0, %v271_v32 }
  0x54   : > { %2633 = vmatprep.mubr.msk.f32.mxu0 %vm343_vm0, %v272_v33 }
  0x57   : > { %2634 = vmatmul.mubr.msk.f32.gmra.mxu0 %vm343_vm0, %v273_v34 }
  0x58   : > { %2636 = vmatprep.mubr.msk.f32.mxu0 %vm343_vm0, %v274_v35 }
  0x5b   : > { %2637 = vmatmul.mubr.msk.f32.gmra.mxu0 %vm343_vm0, %v275_v36 }
  0x5c   : > { %2639 = vmatprep.mubr.msk.f32.mxu0 %vm343_vm0, %v276_v37 }
  0x5f   : > { %2640 = vmatmul.mubr.msk.f32.gmra.mxu0 %vm343_vm0, %v277_v38 }
  0x60   : > { %2642 = vmatprep.mubr.msk.f32.mxu0 %vm343_vm0, %v278_v39 }
  0x63   : > { %2643 = vmatmul.mubr.msk.f32.gmra.mxu0 %vm343_vm0, %v279_v40 }
  0x64   : > { %2645 = vmatprep.mubr.msk.f32.mxu0 %vm343_vm0, %v280_v41  ;;  %v3488_v41 = vld [vmem:[%s3948_s3] sm:$0x1] }
  0x65   : > { %2528 = vmatprep.mubr.msk.f32.mxu1 %vm1540_vm1, %v3488_v41 }
  0x67   : > { %2646 = vmatmul.mubr.msk.f32.gmra.mxu0 %vm343_vm0, %v281_v42 }
  0x68   : > { %2648 = vmatprep.mubr.msk.f32.mxu0 %vm343_vm0, %v282_v43 }
  0x6b   : > { %2649 = vmatmul.mubr.msk.f32.gmra.mxu0 %vm343_vm0, %v283_v44 }
  0x6c   : > { %2651 = vmatprep.mubr.msk.f32.mxu0 %vm343_vm0, %v284_v45 }
  0x6f   : > { %2652 = vmatmul.mubr.msk.f32.gmra.mxu0 %vm343_vm0, %v285_v46 }
  0x70   : > { %2654 = vmatprep.mubr.msk.f32.mxu0 %vm343_vm0, %v286_v47 }
  0x73   : > { %2655 = vmatmul.mubr.msk.f32.gmra.mxu0 %vm343_vm0, %v287_v48  ;;  %v3507_v48 = vld [vmem:[%s3947_s2] ss:$0 sm:$0xff] }
  0x74   : > { %2657 = vmatprep.mubr.msk.f32.mxu0 %vm343_vm0, %v288_v49 }
  0x77   : > { %2658 = vmatmul.mubr.msk.f32.gmra.mxu0 %vm343_vm0, %v289_v50 }
  0x78   : > { %2660 = vmatprep.mubr.msk.f32.mxu0 %vm343_vm0, %v290_v51 }
  0x7b   : > { %2661 = vmatmul.mubr.msk.f32.gmra.mxu0 %vm343_vm0, %v291_v52 }
  0x7c   : > { %2663 = vmatprep.mubr.msk.f32.mxu0 %vm343_vm0, %v292_v53 }
  0x7f   : > { %2664 = vmatmul.mubr.msk.f32.gmra.mxu0 %vm343_vm0, %v293_v54 }
  0x80   : > { %2666 = vmatprep.mubr.msk.f32.mxu0 %vm343_vm0, %v294_v55 }
  0x83   : > { %2667 = vmatmul.mubr.msk.f32.gmra.mxu0 %vm343_vm0, %v295_v56 }
  0x84   : > { %2669 = vmatprep.mubr.msk.f32.mxu0 %vm343_vm0, %v296_v57 }
  0x87   : > { %2670 = vmatmul.mubr.msk.f32.gmra.mxu0 %vm343_vm0, %v297_v58 }
  0x88   : > { %2672 = vmatprep.mubr.msk.f32.mxu0 %vm343_vm0, %v298_v59 }
  0x8b   : > { %2673 = vmatmul.mubr.msk.f32.gmra.mxu0 %vm343_vm0, %v299_v60 }
  0x8c   : > { %2675 = vmatprep.mubr.msk.f32.mxu0 %vm343_vm0, %v300_v61 }
  0x8f   : > { %2676 = vmatmul.mubr.msk.f32.gmra.mxu0 %vm343_vm0, %v301_v62 }
  0x90   : > { %2678 = vmatprep.mubr.msk.f32.mxu0 %vm343_vm0, %v302_v63 }
  0x93   : > { %2679 = vmatmul.mubr.msk.f32.gmra.mxu0 %vm343_vm0, %v303_v0 }
  0x94   : > { %2681 = vmatprep.mubr.msk.f32.mxu0 %vm343_vm0, %v304_v1 }
  0x97   : > { %2682 = vmatmul.mubr.msk.f32.gmra.mxu0 %vm343_vm0, %v305_v2 }
  0x98   : > { %2684 = vmatprep.mubr.msk.f32.mxu0 %vm343_vm0, %v306_v3 }
  0x9b   : > { %2685 = vmatmul.mubr.msk.f32.gmra.mxu0 %vm343_vm0, %v307_v4 }
  0x9c   : > { %2687 = vmatprep.mubr.msk.f32.mxu0 %vm343_vm0, %v308_v5 }
  0x9f   : > { %2688 = vmatmul.mubr.msk.f32.gmra.mxu0 %vm343_vm0, %v309_v6 }
  0xa0   : > { %2690 = vmatprep.mubr.msk.f32.mxu0 %vm343_vm0, %v310_v7 }
  0xa3   : > { %2691 = vmatmul.mubr.msk.f32.gmra.mxu0 %vm343_vm0, %v311_v8 }
  0xa4   : > { %2693 = vmatprep.mubr.msk.f32.mxu0 %vm343_vm0, %v312_v9 }
  0xa7   : > { %2694 = vmatmul.mubr.msk.f32.gmra.mxu0 %vm343_vm0, %v313_v10 }
  0xa8   : > { %2696 = vmatprep.mubr.msk.f32.mxu0 %vm343_vm0, %v314_v11 }
  0xab   : > { %2697 = vmatmul.mubr.msk.f32.gmra.mxu0 %vm343_vm0, %v315_v12 }
  0xac   : > { %2699 = vmatprep.mubr.msk.f32.mxu0 %vm343_vm0, %v316_v13 }
  0xaf   : > { %2700 = vmatmul.mubr.msk.f32.gmra.mxu0 %vm343_vm0, %v317_v14 }
  0xb0   : > { %2702 = vmatprep.mubr.msk.f32.mxu0 %vm343_vm0, %v318_v15 }
  0xb3   : > { %2703 = vmatmul.mubr.msk.f32.gmra.mxu0 %vm343_vm0, %v319_v16 }
  0xb4   : > { %2705 = vmatprep.mubr.msk.f32.mxu0 %vm343_vm0, %v320_v17  ;;  %v3201_v17 = vmov 0.0  }
  0xb5   : > { %2717 = vmatprep.subr.mxu0 %v3201_v17 }
  0xb7   : > { %2706 = vmatmul.mubr.msk.f32.gmra.mxu0 %vm343_vm0, %v321_v18 }
  0xb8   : > { %2708 = vmatprep.mubr.msk.f32.mxu0 %vm343_vm0, %v322_v19 }
  0xbb   : > { %2709 = vmatmul.mubr.msk.f32.gmra.mxu0 %vm343_vm0, %v323_v20 }
  0xbc   : > { %2711 = vmatprep.mubr.msk.f32.mxu0 %vm343_vm0, %v324_v21 }
  0xbf   : > { %2712 = vmatmul.mubr.msk.f32.gmra.mxu0 %vm343_vm0, %v325_v22 }
  0xc0   : > { %2714 = vmatprep.mubr.msk.f32.mxu0 %vm343_vm0, %v326_v23 }
  0xc3   : > { %2715 = vmatmul.mubr.msk.f32.gmra.mxu0 %vm343_vm0, %v327_v24 }
  0xc4   : > { %2749 = vmatprep.mubr.msk.f32.mxu0 %vm3202_vm2, %v3201_v17 }
  0xe7   : > { %v2599_v25 = vpop.f32.mrf.mxu0 }
  0xe8   : > { %v656_v51 = vadd.f32 %v2599_v25, %v3507_v48 }
  0xe9   : > { %v650_v26 = vpop.f32.mrf.mxu0 }
  0xea   : > { %v2237_v54 = vmul.f32 -1.442695, %v656_v51  ;;  %v651_v55 = vadd.f32 %v3507_v48, %v650_v26 }
  0xeb   : > { %v2602_v27 = vpop.f32.mrf.mxu0 }
  0xec   : > { %v666_v56 = vadd.f32 %v2602_v27, %v3507_v48  ;;  %2797 = vpow2.f32 %v2237_v54  ;;  %v2236_v61 = vmul.f32 -1.442695, %v651_v55 }
  0xed   : > { %v660_v28 = vpop.f32.mrf.mxu0 }
  0xee   : > { %v661_v59 = vadd.f32 %v3507_v48, %v660_v28  ;;  %v2239_v62 = vmul.f32 -1.442695, %v666_v56  ;;  %2799 = vpow2.f32 %v2236_v61 }
  0xef   : > { %v2605_v29 = vpop.f32.mrf.mxu0 }
  0xf0   : > { %v676_v63 = vadd.f32 %v2605_v29, %v3507_v48  ;;  %v2238_v3 = vmul.f32 -1.442695, %v661_v59  ;;  %2801 = vpow2.f32 %v2239_v62 }
  0xf1   : > { %v670_v30 = vpop.f32.mrf.mxu0 }
  0xf2   : > { %v2241_v6 = vmul.f32 -1.442695, %v676_v63  ;;  %v671_v8 = vadd.f32 %v3507_v48, %v670_v30 }
  0xf3   : > { %v2608_v31 = vpop.f32.mrf.mxu0 }
  0xf4   : > { %v686_v13 = vadd.f32 %v2608_v31, %v3507_v48  ;;  %v2240_v20 = vmul.f32 -1.442695, %v671_v8 }
  0xf5   : > { %v680_v32 = vpop.f32.mrf.mxu0 }
  0xf6   : > { %v681_v21 = vadd.f32 %v3507_v48, %v680_v32  ;;  %v2243_v26 = vmul.f32 -1.442695, %v686_v13 }
  0xf7   : > { %v3477_v33 = vpop.f32.mrf.mxu0 }
  0xf8   : > { %v2242_v31 = vmul.f32 -1.442695, %v681_v21  ;;  %v696_v32 = vadd.f32 %v3477_v33, %v3507_v48 }
  0xf9   : > { %v3479_v34 = vpop.f32.mrf.mxu0  ;;  %v2798_v27 = vpop.eup %2797 }
  0xfb   : > { %v3481_v35 = vpop.f32.mrf.mxu0  ;;  %v3549_v54 = vpop.eup %2799 }
  0xfd   : > { %v3483_v36 = vpop.f32.mrf.mxu0  ;;  %v3554_v33 = vpop.eup %2801 }
  0xfe   : > { %v701_v51 = vadd.f32 %v3507_v48, %v3483_v36 }
  0xff   : > { %v2617_v37 = vpop.f32.mrf.mxu0 }
 0x100   : > { %v716_v11 = vadd.f32 %v2617_v37, %v3507_v48  ;;  %v706_v37 = vadd.f32 %v3481_v35, %v3507_v48  ;;  %v2245_v35 = vmul.f32 -1.442695, %v696_v32  ;;  %v2246_v36 = vmul.f32 -1.442695, %v701_v51 }
 0x101   : > { %v710_v38 = vpop.f32.mrf.mxu0 }
 0x102   : > { %v2249_v23 = vmul.f32 -1.442695, %v716_v11  ;;  %v711_v24 = vadd.f32 %v3507_v48, %v710_v38  ;;  %v2247_v59 = vmul.f32 -1.442695, %v706_v37 }
 0x103   : > { %v2620_v39 = vpop.f32.mrf.mxu0 }
 0x104   : > { %v726_v58 = vadd.f32 %v2620_v39, %v3507_v48  ;;  %v2248_v38 = vmul.f32 -1.442695, %v711_v24 }
 0x105   : > { %v720_v40 = vpop.f32.mrf.mxu0 }
 0x106   : > { %v2251_v1 = vmul.f32 -1.442695, %v726_v58  ;;  %v721_v2 = vadd.f32 %v3507_v48, %v720_v40  ;;  %v1290_v40 = vadd.f32 1.0, %v2798_v27 }
 0x107   : > { %v3490_v42 = vpop.f32.mrf.mxu0 }
 0x108   : > { %2803 = vpow2.f32 %v2251_v1  ;;  %v2250_v9 = vmul.f32 -1.442695, %v721_v2  ;;  %v691_v2 = vadd.f32 %v3507_v48, %v3479_v34  ;;  %v736_v34 = vadd.f32 %v3490_v42, %v3507_v48 }
 0x109   : > { %v3494_v43 = vpop.f32.mrf.mxu0  ;;  %2805 = vpow2.f32 %v2238_v3 }
 0x10a   : > { %2807 = vpow2.f32 %v2241_v6  ;;  %v2253_v24 = vmul.f32 -1.442695, %v736_v34 }
 0x10b   : > { %v3496_v44 = vpop.f32.mrf.mxu0  ;;  %2809 = vpow2.f32 %v2250_v9 }
 0x10d   : > { %v3498_v45 = vpop.f32.mrf.mxu0 }
 0x10f   : > { %v3500_v46 = vpop.f32.mrf.mxu0 }
 0x111   : > { %v3502_v47 = vpop.f32.mrf.mxu0 }
 0x113   : > { %v3509_v49 = vpop.f32.mrf.mxu0 }
 0x115   : > { %v3511_v50 = vpop.f32.mrf.mxu0  ;;  %v2804_v58 = vpop.eup %2803 }
 0x116   : > { %v3558_v62 = vpop.eup %2805  ;;  %v1304_v3 = vadd.f32 1.0, %v2804_v58  ;;  %v761_v32 = vadd.f32 %v3507_v48, %v3511_v50  ;;  %v756_v50 = vadd.f32 %v3500_v46, %v3507_v48 }
 0x117   : > { %v3514_v52 = vpop.f32.mrf.mxu0  ;;  %v3564_v1 = vpop.eup %2807 }
 0x118   : > { %v776_v63 = vadd.f32 %v3514_v52, %v3507_v48 }
 0x119   : > { %v3516_v53 = vpop.f32.mrf.mxu0 }
 0x11a   : > { %v771_v52 = vadd.f32 %v3507_v48, %v3516_v53  ;;  %v766_v53 = vadd.f32 %v3509_v49, %v3507_v48 }
 0x11b   : > { %v2638_v57 = vpop.f32.mrf.mxu0 }
 0x11c   : > { %v786_v28 = vadd.f32 %v2638_v57, %v3507_v48 }
 0x11d   : > { %v780_v60 = vpop.f32.mrf.mxu0 }
 0x11e   : > { %v2263_v55 = vmul.f32 -1.442695, %v786_v28  ;;  %v781_v56 = vadd.f32 %v3507_v48, %v780_v60 }
 0x11f   : > { %v2641_v0 = vpop.f32.mrf.mxu0 }
 0x120   : > { %v796_v5 = vadd.f32 %v2641_v0, %v3507_v48  ;;  %v2262_v60 = vmul.f32 -1.442695, %v781_v56 }
 0x121   : > { %v790_v4 = vpop.f32.mrf.mxu0 }
 0x122   : > { %v2265_v14 = vmul.f32 -1.442695, %v796_v5  ;;  %v791_v18 = vadd.f32 %v3507_v48, %v790_v4  ;;  %v2810_v4 = vpop.eup %2809 }
 0x123   : > { %v2644_v7 = vpop.f32.mrf.mxu0 }
 0x124   : > { %v806_v10 = vadd.f32 %v2644_v7, %v3507_v48  ;;  %v2264_v29 = vmul.f32 -1.442695, %v791_v18  ;;  %v2261_v7 = vmul.f32 -1.442695, %v776_v63 }
 0x125   : > { %v800_v12 = vpop.f32.mrf.mxu0 }
 0x126   : > { %v2267_v15 = vmul.f32 -1.442695, %v806_v10  ;;  %v801_v16 = vadd.f32 %v3507_v48, %v800_v12  ;;  %v2244_v12 = vmul.f32 -1.442695, %v691_v2 }
 0x127   : > { %v3532_v19 = vpop.f32.mrf.mxu0 }
 0x128   : > { %v2266_v22 = vmul.f32 -1.442695, %v801_v16  ;;  %2811 = vpow2.f32 %v2267_v15 }
 0x129   : > { %v3536_v25 = vpop.f32.mrf.mxu0  ;;  %2813 = vpow2.f32 %v2265_v14  ;;  %v1303_v14 = vadd.f32 1.0, %v2810_v4 }
 0x12a   : > { %2815 = vpow2.f32 %v2266_v22 }
 0x12b   : > { %v3539_v30 = vpop.f32.mrf.mxu0  ;;  %2817 = vpow2.f32 %v2240_v20  ;;  %v2260_v20 = vmul.f32 -1.442695, %v771_v52  ;;  %v751_v52 = vadd.f32 %v3507_v48, %v3502_v47 }
 0x12c   : > { %2819 = vpow2.f32 %v2249_v23 }
 0x12d   : > { %v3545_v39 = vpop.f32.mrf.mxu0  ;;  %2821 = vpow2.f32 %v2243_v26  ;;  %v731_v26 = vadd.f32 %v3507_v48, %v3494_v43  ;;  %v2256_v47 = vmul.f32 -1.442695, %v751_v52 }
 0x12e   : > { %2823 = vpow2.f32 %v2264_v29 }
 0x12f   : > { %v3552_v57 = vpop.f32.mrf.mxu0  ;;  %2825 = vpow2.f32 %v2242_v31  ;;  %v2259_v31 = vmul.f32 -1.442695, %v766_v53  ;;  %v2252_v43 = vmul.f32 -1.442695, %v731_v26 }
 0x130   : > { %2827 = vpow2.f32 %v2248_v38 }
 0x131   : > { %v3556_v61 = vpop.f32.mrf.mxu0  ;;  %2829 = vrcp.f32 %v1290_v40 }
 0x132   : > { %2831 = vpow2.f32 %v2263_v55  ;;  %v746_v55 = vadd.f32 %v3496_v44, %v3507_v48  ;;  %v741_v44 = vadd.f32 %v3507_v48, %v3498_v45 }
 0x133   : > { %v3562_v0 = vpop.f32.mrf.mxu0  ;;  %2833 = vpow2.f32 %v2245_v35 }
 0x134   : > { %2835 = vpow2.f32 %v2247_v59  ;;  %v2255_v4 = vmul.f32 -1.442695, %v746_v55  ;;  %v2254_v45 = vmul.f32 -1.442695, %v741_v44 }
 0x135   : > { %v3568_v5 = vpop.f32.mrf.mxu0  ;;  %v2812_v6 = vpop.eup %2811  ;;  %2837 = vpow2.f32 %v2246_v36  ;;  %v2258_v36 = vmul.f32 -1.442695, %v761_v32 }
 0x136   : > { %v2814_v8 = vpop.eup %2813  ;;  %2839 = vpow2.f32 %v2262_v60  ;;  %v1320_v9 = vadd.f32 1.0, %v2812_v6 }
 0x137   : > { %v3572_v10 = vpop.f32.mrf.mxu0  ;;  %v2816_v11 = vpop.eup %2815  ;;  %2841 = vrcp.f32 %v1304_v3  ;;  %v1318_v22 = vadd.f32 1.0, %v2814_v8 }
 0x138   : > { %v3576_v13 = vpop.eup %2817  ;;  %2843 = vrcp.f32 %v1320_v9  ;;  %v1319_v15 = vadd.f32 1.0, %v2816_v11  ;;  %v2257_v9 = vmul.f32 -1.442695, %v756_v50  ;;  %v1294_v50 = vadd.f32 1.0, %v3564_v1 }
 0x139   : > { %v3578_v16 = vpop.f32.mrf.mxu0  ;;  %v2820_v18 = vpop.eup %2819  ;;  %2845 = vpow2.f32 %v2261_v7 }
 0x13a   : > { %v3582_v21 = vpop.eup %2821  ;;  %2847 = vrcp.f32 %v1319_v15  ;;  %v1302_v28 = vadd.f32 1.0, %v2820_v18 }
 0x13b   : > { %v3584_v23 = vpop.f32.mrf.mxu0  ;;  %v2824_v42 = vpop.eup %2823  ;;  %2849 = vpow2.f32 %v2244_v12  ;;  %v1296_v1 = vadd.f32 1.0, %v3582_v21 }
 0x13c   : > { %v3588_v27 = vpop.eup %2825  ;;  %2851 = vrcp.f32 %v1303_v14  ;;  %v1317_v38 = vadd.f32 1.0, %v2824_v42 }
 0x13d   : > { %v3590_v29 = vpop.f32.mrf.mxu0  ;;  %v2828_v49 = vpop.eup %2827  ;;  %2853 = vpow2.f32 %v2260_v20 }
 0x13e   : > { %v3594_v37 = vpop.eup %2829  ;;  %2855 = vrcp.f32 %v1318_v22  ;;  %v1301_v35 = vadd.f32 1.0, %v2828_v49 }
 0x13f   : > { %v3596_v40 = vpop.f32.mrf.mxu0  ;;  %v2832_v51 = vpop.eup %2831  ;;  %2857 = vpow2.f32 %v2253_v24 }
 0x140   : > { %v2834_v56 = vpop.eup %2833  ;;  %2859 = vrcp.f32 %v1302_v28  ;;  %v1316_v60 = vadd.f32 1.0, %v2832_v51  ;;  %v1289_v28 = vadd.f32 1.0, %v3549_v54 }
 0x141   : > { %v3600_v58 = vpop.f32.mrf.mxu0  ;;  %v2836_v59 = vpop.eup %2835  ;;  %2861 = vpow2.f32 %v2259_v31  ;;  %v1292_v31 = vadd.f32 1.0, %v3554_v33  ;;  %v1298_v51 = vadd.f32 1.0, %v2834_v56 }
 0x142   : > { %v2838_v63 = vpop.eup %2837  ;;  %2863 = vrcp.f32 %v1317_v38  ;;  %v1300_v7 = vadd.f32 1.0, %v2836_v59  ;;  %v1291_v59 = vadd.f32 1.0, %v3558_v62  ;;  %v1293_v62 = vadd.f32 1.0, %v3576_v13 }
 0x143   : > { %v3604_v2 = vpop.f32.mrf.mxu0  ;;  %v2840_v3 = vpop.eup %2839  ;;  %2865 = vpow2.f32 %v2252_v43  ;;  %v1299_v20 = vadd.f32 1.0, %v2838_v63 }
 0x144   : > { %v2842_v6 = vpop.eup %2841  ;;  %2867 = vrcp.f32 %v1301_v35  ;;  %v1315_v12 = vadd.f32 1.0, %v2840_v3 }
 0x145   : > { %v3610_v46 = vpop.f32.mrf.mxu0  ;;  %v2844_v8 = vpop.eup %2843  ;;  %2869 = vpow2.f32 %v2258_v36 }
 0x146   : > { %v2846_v11 = vpop.eup %2845  ;;  %2871 = vrcp.f32 %v1316_v60  ;;  %2496 = vmatprep.subr.msk.mxu1 %vm1540_vm1, %v2844_v8  ;;  %v1295_v8 = vadd.f32 1.0, %v3588_v27 }
 0x147   : > { %v3613_v34 = vpop.f32.mrf.mxu0  ;;  %v2848_v14 = vpop.eup %2847  ;;  %2873 = vpow2.f32 %v2255_v4  ;;  %2497 = vmatpush3.xpose.msk.msra.mxu1 %vm1540_vm1, %v2842_v6  ;;  %v1314_v42 = vadd.f32 1.0, %v2846_v11 }
 0x148   : > { %v2850_v15 = vpop.eup %2849  ;;  %2875 = vrcp.f32 %v1300_v7  ;;  %2498 = vmatprep.subr.msk.mxu1 %vm1540_vm1, %v2848_v14 }
 0x149   : > { %v3617_v18 = vpop.f32.mrf.mxu0  ;;  %v2852_v53 = vpop.eup %2851  ;;  %2877 = vpow2.f32 %v2257_v9  ;;  %v1297_v63 = vadd.f32 1.0, %v2850_v15 }
 0x14a   : > { %v2854_v22 = vpop.eup %2853  ;;  %2879 = vrcp.f32 %v1315_v12 }
 0x14b   : > { %v3619_v24 = vpop.f32.mrf.mxu0  ;;  %v2856_v26 = vpop.eup %2855  ;;  %2881 = vpow2.f32 %v2254_v45  ;;  %2499 = vmatpush3.xpose.msk.msra.mxu1 %vm1540_vm1, %v2852_v53  ;;  %v1313_v55 = vadd.f32 1.0, %v2854_v22  ;;  %v816_v53 = vadd.f32 %v3532_v19, %v3507_v48 }
 0x14c   : > { %v2858_v49 = vpop.eup %2857  ;;  %2883 = vpow2.f32 %v2256_v47  ;;  %2500 = vmatprep.subr.msk.mxu1 %vm1540_vm1, %v2856_v26 }
 0x14d   : > { %v3625_v32 = vpop.f32.mrf.mxu0  ;;  %v2860_v38 = vpop.eup %2859  ;;  %2885 = vrcp.f32 %v1299_v20  ;;  %v1306_v14 = vadd.f32 1.0, %v2858_v49 }
 0x14e   : > { %v2862_v43 = vpop.eup %2861  ;;  %2887 = vrcp.f32 %v1314_v42  ;;  %v811_v42 = vadd.f32 %v3507_v48, %v3536_v25 }
 0x14f   : > { %v3627_v35 = vpop.f32.mrf.mxu0  ;;  %v2864_v54 = vpop.eup %2863  ;;  %2889 = vrcp.f32 %v1289_v28  ;;  %2501 = vmatpush3.xpose.msk.msra.mxu1 %vm1540_vm1, %v2860_v38  ;;  %v1312_v3 = vadd.f32 1.0, %v2862_v43 }
 0x150   : > { %v2866_v33 = vpop.eup %2865  ;;  %2891 = vrcp.f32 %v1292_v31  ;;  %2502 = vmatprep.subr.msk.mxu1 %vm1540_vm1, %v2864_v54  ;;  %v886_v31 = vadd.f32 %v3604_v2, %v3507_v48  ;;  %v821_v2 = vadd.f32 %v3507_v48, %v3545_v39 }
 0x151   : > { %v3633_v36 = vpop.f32.mrf.mxu0  ;;  %v2868_v56 = vpop.eup %2867  ;;  %2893 = vrcp.f32 %v1298_v51  ;;  %v1305_v21 = vadd.f32 1.0, %v2866_v33  ;;  %v826_v51 = vadd.f32 %v3539_v30, %v3507_v48  ;;  %v846_v33 = vadd.f32 %v3562_v0, %v3507_v48 }
 0x152   : > { %v2870_v60 = vpop.eup %2869  ;;  %2895 = vrcp.f32 %v1313_v55  ;;  %v2269_v55 = vmul.f32 -1.442695, %v816_v53  ;;  %v2283_v30 = vmul.f32 -1.442695, %v886_v31  ;;  %v2270_v0 = vmul.f32 -1.442695, %v821_v2 }
 0x153   : > { %v3635_v4 = vpop.f32.mrf.mxu0  ;;  %v2872_v44 = vpop.eup %2871  ;;  %2897 = vrcp.f32 %v1291_v59  ;;  %2503 = vmatpush3.xpose.msk.msra.mxu1 %vm1540_vm1, %v2868_v56  ;;  %v1311_v11 = vadd.f32 1.0, %v2870_v60  ;;  %v2268_v59 = vmul.f32 -1.442695, %v811_v42  ;;  %v866_v31 = vadd.f32 %v3584_v23, %v3507_v48 }
 0x154   : > { %v2874_v6 = vpop.eup %2873  ;;  %2899 = vrcp.f32 %v1294_v50  ;;  %2504 = vmatprep.subr.msk.mxu1 %vm1540_vm1, %v2872_v44  ;;  %v871_v2 = vadd.f32 %v3507_v48, %v3600_v58  ;;  %v831_v23 = vadd.f32 %v3507_v48, %v3556_v61  ;;  %v851_v61 = vadd.f32 %v3507_v48, %v3578_v16 }
 0x155   : > { %v3641_v7 = vpop.f32.mrf.mxu0  ;;  %v2876_v52 = vpop.eup %2875  ;;  %2901 = vrcp.f32 %v1297_v63  ;;  %v1308_v27 = vadd.f32 1.0, %v2874_v6  ;;  %v881_v63 = vadd.f32 %v3507_v48, %v3610_v46  ;;  %v1530_v46 = vld [vmem:[#allocation2] sm:$0x1] }
 0x156   : > { %v2878_v9 = vpop.eup %2877  ;;  %2903 = vrcp.f32 %v1312_v3  ;;  %v2271_v3 = vmul.f32 -1.442695, %v826_v51 }
 0x157   : > { %v3644_v12 = vpop.f32.mrf.mxu0  ;;  %v2880_v13 = vpop.eup %2879  ;;  %2905 = vrcp.f32 %v1293_v62  ;;  %2505 = vmatpush3.xpose.msk.msra.mxu1 %vm1540_vm1, %v2876_v52  ;;  %v1310_v22 = vadd.f32 1.0, %v2878_v9  ;;  %v841_v9 = vadd.f32 %v3507_v48, %v3568_v5 }
 0x158   : > { %v2882_v45 = vpop.eup %2881  ;;  %2907 = vrcp.f32 %v1296_v1  ;;  %2506 = vmatprep.subr.msk.mxu1 %vm1540_vm1, %v2880_v13  ;;  %v2275_v1 = vmul.f32 -1.442695, %v846_v33 }
 0x159   : > { %v3648_v15 = vpop.f32.mrf.mxu0  ;;  %v2884_v47 = vpop.eup %2883  ;;  %2909 = vrcp.f32 %v1295_v8  ;;  %v1307_v49 = vadd.f32 1.0, %v2882_v45  ;;  %v836_v45 = vadd.f32 %v3552_v57, %v3507_v48 }
 0x15a   : > { %v2886_v20 = vpop.eup %2885  ;;  %2911 = vrcp.f32 %v1311_v11  ;;  %v1309_v19 = vadd.f32 1.0, %v2884_v47  ;;  %v2282_v11 = vmul.f32 -1.442695, %v881_v63  ;;  %v3203_v47 = vmov 0  }
 0x15b   : > { %v3654_v26 = vpop.f32.mrf.mxu0  ;;  %v2888_v28 = vpop.eup %2887  ;;  %2913 = vrcp.f32 %v1306_v14  ;;  %2507 = vmatpush3.xpose.msk.msra.mxu1 %vm1540_vm1, %v2886_v20  ;;  %2796 = vset.pattern.permute.xlu0 %v3203_v47  ;;  %v2273_v33 = vmul.f32 -1.442695, %v836_v45  ;;  %v2276_v45 = vmul.f32 -1.442695, %v851_v61 }
 0x15c   : > { %v3659_v38 = vpop.eup %2889  ;;  %2915 = vrcp.f32 %v1305_v21  ;;  %2508 = vmatprep.subr.msk.mxu1 %vm1540_vm1, %v2888_v28  ;;  %v876_v21 = vadd.f32 %v3596_v40, %v3507_v48  ;;  %1533 = vperm.xlu0 %2796, %v1530_v46   ;;  %v2274_v40 = vmul.f32 -1.442695, %v841_v9  ;;  %v861_v46 = vadd.f32 %v3507_v48, %v3590_v29 }
 0x15d   : > { %v3664_v25 = vpop.f32.mrf.mxu0  ;;  %v3666_v43 = vpop.eup %2891  ;;  %2917 = vrcp.f32 %v1308_v27  ;;  %v936_v29 = vadd.f32 %v3644_v12, %v3507_v48 }
 0x15e   : > { %v2894_v54 = vpop.eup %2893  ;;  %2919 = vrcp.f32 %v1310_v22 }
 0x15f   : > { %v2689_v50 = vpop.f32.mrf.mxu0  ;;  %v2896_v56 = vpop.eup %2895  ;;  %2921 = vrcp.f32 %v1307_v49  ;;  %2509 = vmatpush3.xpose.msk.msra.mxu1 %vm1540_vm1, %v2894_v54 }
 0x160   : > { %v3675_v60 = vpop.eup %2897  ;;  %2923 = vrcp.f32 %v1309_v19  ;;  %2510 = vmatprep.subr.msk.mxu1 %vm1540_vm1, %v2896_v56  ;;  %v956_v62 = vadd.f32 %v2689_v50, %v3507_v48  ;;  %v946_v56 = vadd.f32 %v3654_v26, %v3507_v48 }
 0x161   : > { %v950_v39 = vpop.f32.mrf.mxu0  ;;  %v3678_v44 = vpop.eup %2899  ;;  %2925 = vpow2.f32 %v2269_v55  ;;  %v2281_v55 = vmul.f32 -1.442695, %v876_v21 }
 0x162   : > { %v2902_v6 = vpop.eup %2901  ;;  %2927 = vpow2.f32 %v2268_v59  ;;  %v2297_v53 = vmul.f32 -1.442695, %v956_v62  ;;  %v951_v28 = vadd.f32 %v3507_v48, %v950_v39  ;;  %v2279_v39 = vmul.f32 -1.442695, %v866_v31 }
 0x163   : > { %v2692_v52 = vpop.f32.mrf.mxu0  ;;  %v2904_v8 = vpop.eup %2903  ;;  %2929 = vpow2.f32 %v2283_v30  ;;  %2511 = vmatpush3.xpose.msk.msra.mxu1 %vm1540_vm1, %v2902_v6  ;;  %v2280_v62 = vmul.f32 -1.442695, %v871_v2 }
 0x164   : > { %v966_v13 = vadd.f32 %v2692_v52, %v3507_v48  ;;  %v3686_v14 = vpop.eup %2905  ;;  %2931 = vpow2.f32 %v2271_v3  ;;  %2512 = vmatprep.subr.msk.mxu1 %vm1540_vm1, %v2904_v8  ;;  %v2296_v30 = vmul.f32 -1.442695, %v951_v28  ;;  %v856_v3 = vadd.f32 %v3572_v10, %v3507_v48 }
 0x165   : > { %v960_v5 = vpop.f32.mrf.mxu0  ;;  %v2908_v27 = vpop.eup %2907  ;;  %2933 = vpow2.f32 %v2270_v0  ;;  %v941_v52 = vadd.f32 %v3507_v48, %v3664_v25  ;;  %v2295_v8 = vmul.f32 -1.442695, %v946_v56  ;;  %v2293_v28 = vmul.f32 -1.442695, %v936_v29 }
 0x166   : > { %v2299_v20 = vmul.f32 -1.442695, %v966_v13  ;;  %v961_v22 = vadd.f32 %v3507_v48, %v960_v5  ;;  %v2910_v42 = vpop.eup %2909  ;;  %2935 = vpow2.f32 %v2275_v1  ;;  %v2272_v1 = vmul.f32 -1.442695, %v831_v23 }
 0x167   : > { %v3695_v57 = vpop.f32.mrf.mxu0  ;;  %v2912_v49 = vpop.eup %2911  ;;  %2937 = vpow2.f32 %v2282_v11  ;;  %2513 = vmatpush3.xpose.msk.msra.mxu1 %vm1540_vm1, %v2908_v27  ;;  %v2277_v11 = vmul.f32 -1.442695, %v856_v3  ;;  %v2294_v5 = vmul.f32 -1.442695, %v941_v52  ;;  %v2278_v27 = vmul.f32 -1.442695, %v861_v46 }
 0x168   : > { %v2298_v19 = vmul.f32 -1.442695, %v961_v22  ;;  %v3700_v51 = vpop.eup %2913  ;;  %2939 = vpow2.f32 %v2299_v20  ;;  %2514 = vmatprep.subr.msk.mxu1 %vm1540_vm1, %v2912_v49  ;;  %v931_v49 = vadd.f32 %v3507_v48, %v3648_v15  ;;  %v926_v56 = vadd.f32 %v3635_v4, %v3507_v48 }
 0x169   : > { %v3705_v54 = vpop.f32.mrf.mxu0  ;;  %v3707_v59 = vpop.eup %2915  ;;  %2941 = vpow2.f32 %v2297_v53  ;;  %v921_v52 = vadd.f32 %v3507_v48, %v3641_v7 }
 0x16a   : > { %v2918_v50 = vpop.eup %2917  ;;  %2943 = vpow2.f32 %v2298_v19 }
 0x16b   : > { %v3713_v63 = vpop.f32.mrf.mxu0  ;;  %v2920_v58 = vpop.eup %2919  ;;  %2945 = vpow2.f32 %v2274_v40  ;;  %2515 = vmatpush3.xpose.msk.msra.mxu1 %vm1540_vm1, %v2910_v42 }
 0x16c   : > { %v2922_v0 = vpop.eup %2921  ;;  %2947 = vpow2.f32 %v2281_v55  ;;  %2516 = vmatprep.subr.msk.mxu1 %vm1540_vm1, %v2920_v58 }
 0x16d   : > { %v3721_v26 = vpop.f32.mrf.mxu0  ;;  %v2924_v6 = vpop.eup %2923  ;;  %2949 = vpow2.f32 %v2273_v33 }
 0x16e   : > { %v3725_v10 = vpop.eup %2925  ;;  %2951 = vpow2.f32 %v2296_v30  ;;  %v2292_v30 = vmul.f32 -1.442695, %v931_v49 }
 0x16f   : > { %v3729_v16 = vpop.f32.mrf.mxu0  ;;  %v3731_v9 = vpop.eup %2927  ;;  %2953 = vpow2.f32 %v2279_v39  ;;  %2517 = vmatpush3.xpose.msk.msra.mxu1 %vm1540_vm1, %v3678_v44 }
 0x170   : > { %v2930_v13 = vpop.eup %2929  ;;  %2955 = vpow2.f32 %v2280_v62  ;;  %2518 = vmatprep.subr.msk.mxu1 %vm1540_vm1, %v2924_v6 }
 0x171   : > { %v3736_v25 = vpop.f32.mrf.mxu0  ;;  %v3738_v21 = vpop.eup %2931  ;;  %2957 = vpow2.f32 %v2272_v1  ;;  %v1336_v20 = vadd.f32 1.0, %v2930_v13  ;;  %v2291_v1 = vmul.f32 -1.442695, %v926_v56 }
 0x172   : > { %v3742_v47 = vpop.eup %2933  ;;  %2959 = vpow2.f32 %v2295_v8 }
 0x173   : > { %v3744_v53 = vpop.f32.mrf.mxu0  ;;  %v2936_v44 = vpop.eup %2935  ;;  %2961 = vpow2.f32 %v2277_v11  ;;  %2519 = vmatpush3.xpose.msk.msra.mxu1 %vm1540_vm1, %v3686_v14 }
 0x174   : > { %v2938_v22 = vpop.eup %2937  ;;  %2963 = vpow2.f32 %v2276_v45  ;;  %2520 = vmatprep.subr.msk.mxu1 %vm1540_vm1, %v2918_v50  ;;  %v1328_v2 = vadd.f32 1.0, %v2936_v44  ;;  %v916_v45 = vadd.f32 %v3627_v35, %v3507_v48 }
 0x175   : > { %v3749_v42 = vpop.f32.mrf.mxu0  ;;  %v2940_v12 = vpop.eup %2939  ;;  %2965 = vpow2.f32 %v2294_v5  ;;  %v1335_v33 = vadd.f32 1.0, %v2938_v22 }
 0x176   : > { %v2942_v40 = vpop.eup %2941  ;;  %2967 = vpow2.f32 %v2278_v27  ;;  %v1352_v31 = vadd.f32 1.0, %v2940_v12  ;;  %v2290_v27 = vmul.f32 -1.442695, %v921_v52  ;;  %v2289_v35 = vmul.f32 -1.442695, %v916_v45 }
 0x177   : > { %v3753_v19 = vpop.f32.mrf.mxu0  ;;  %v2944_v55 = vpop.eup %2943  ;;  %2969 = vrcp.f32 %v1336_v20  ;;  %2521 = vmatpush3.xpose.msk.msra.mxu1 %vm1540_vm1, %v3666_v43  ;;  %v1350_v3 = vadd.f32 1.0, %v2942_v40 }
 0x178   : > { %v2946_v14 = vpop.eup %2945  ;;  %2971 = vrcp.f32 %v1352_v31  ;;  %v1351_v23 = vadd.f32 1.0, %v2944_v55  ;;  %2522 = vmatprep.subr.msk.mxu1 %vm1540_vm1, %v2922_v0 }
 0x179   : > { %v3758_v50 = vpop.f32.mrf.mxu0  ;;  %v2948_v15 = vpop.eup %2947  ;;  %2973 = vpow2.f32 %v2293_v28  ;;  %v1327_v61 = vadd.f32 1.0, %v2946_v14 }
 0x17a   : > { %v3762_v58 = vpop.eup %2949  ;;  %2975 = vrcp.f32 %v1351_v23  ;;  %v1334_v62 = vadd.f32 1.0, %v2948_v15 }
 0x17b   : > { %v3764_v39 = vpop.f32.mrf.mxu0  ;;  %v2952_v43 = vpop.eup %2951  ;;  %2977 = vrcp.f32 %v1328_v2  ;;  %2523 = vmatpush3.xpose.msk.msra.mxu1 %vm1540_vm1, %v3675_v60 }
 0x17c   : > { %v2954_v0 = vpop.eup %2953  ;;  %2979 = vrcp.f32 %v1335_v33  ;;  %2524 = vmatprep.subr.msk.mxu1 %vm1540_vm1, %v3700_v51  ;;  %v1349_v8 = vadd.f32 1.0, %v2952_v43  ;;  %v906_v43 = vadd.f32 %v3619_v24, %v3507_v48  ;;  %v1026_v52 = vadd.f32 %v3764_v39, %v3507_v48 }
 0x17d   : > { %v3770_v4 = vpop.f32.mrf.mxu0  ;;  %v2956_v6 = vpop.eup %2955  ;;  %2981 = vpow2.f32 %v2292_v30  ;;  %v1332_v13 = vadd.f32 1.0, %v2954_v0 }
 0x17e   : > { %v3774_v46 = vpop.eup %2957  ;;  %2983 = vrcp.f32 %v1350_v3  ;;  %v1333_v29 = vadd.f32 1.0, %v2956_v6 }
 0x17f   : > { %v2713_v11 = vpop.f32.mrf.mxu0  ;;  %v2960_v60 = vpop.eup %2959  ;;  %2985 = vrcp.f32 %v1327_v61  ;;  %2525 = vmatpush3.xpose.msk.msra.mxu1 %vm1540_vm1, %v3594_v37 }
 0x180   : > { %v2962_v51 = vpop.eup %2961  ;;  %2987 = vrcp.f32 %v1334_v62  ;;  %2526 = vmatprep.subr.msk.mxu1 %vm1540_vm1, %v3707_v59  ;;  %v1348_v20 = vadd.f32 1.0, %v2960_v60  ;;  %v911_v59 = vadd.f32 %v3507_v48, %v3633_v36  ;;  %v1036_v49 = vadd.f32 %v2713_v11, %v3507_v48 }
 0x181   : > { %v1030_v7 = vpop.f32.mrf.mxu0  ;;  %v2964_v5 = vpop.eup %2963  ;;  %2989 = vpow2.f32 %v2291_v1  ;;  %v1330_v1 = vadd.f32 1.0, %v2962_v51  ;;  %v2287_v11 = vmul.f32 -1.442695, %v906_v43  ;;  %v901_v60 = vadd.f32 %v3507_v48, %v3625_v32 }
 0x182   : > { %v2966_v44 = vpop.eup %2965  ;;  %2991 = vrcp.f32 %v1349_v8  ;;  %v2313_v56 = vmul.f32 -1.442695, %v1036_v49  ;;  %v1031_v30 = vadd.f32 %v3507_v48, %v1030_v7  ;;  %v2288_v61 = vmul.f32 -1.442695, %v911_v59 }
 0x183   : > { %v2716_v22 = vpop.f32.mrf.mxu0  ;;  %v2968_v12 = vpop.eup %2967  ;;  %2993 = vrcp.f32 %v1332_v13  ;;  %2527 = vmatpush3.xpose.msk.msra.mxu1 %vm1540_vm1, %v3659_v38  ;;  %v1347_v55 = vadd.f32 1.0, %v2966_v44  ;;  %v1021_v7 = vadd.f32 %v3507_v48, %v3770_v4  ;;  %v896_v32 = vadd.f32 %v3613_v34, %v3507_v48  ;;  %v3818_v4 = vld [vmem:[%s3947_s2] ss:$0 sm:$0xff] }
 0x184   : > { %v1046_v28 = vadd.f32 %v2716_v22, %v3507_v48  ;;  %v2970_v37 = vpop.eup %2969  ;;  %2995 = vrcp.f32 %v1333_v29  ;;  %v1331_v23 = vadd.f32 1.0, %v2968_v12  ;;  %v2312_v8 = vmul.f32 -1.442695, %v1031_v30 }
 0x185   : > { %v1040_v40 = vpop.f32.mrf.mxu0  ;;  %v2972_v31 = vpop.eup %2971  ;;  %2997 = vpow2.f32 %v2290_v27  ;;  %v1329_v29 = vadd.f32 1.0, %v2964_v5  ;;  %v2311_v27 = vmul.f32 -1.442695, %v1026_v52  ;;  %v2285_v34 = vmul.f32 -1.442695, %v896_v32 }
 0x186   : > { %v2315_v2 = vmul.f32 -1.442695, %v1046_v28  ;;  %v1041_v14 = vadd.f32 %v3507_v48, %v1040_v40  ;;  %v2974_v33 = vpop.eup %2973  ;;  %2999 = vrcp.f32 %v1348_v20  ;;  %2530 = vmatprep.subr.msk.mxu1 %vm1540_vm1, %v2972_v31  ;;  %2529 = vmatmul.mubr.msk.f32.vlgmr.msra.gmra.mxu1 %vm1540_vm1, %v3488_v41  ;;  %v2286_v20 = vmul.f32 -1.442695, %v901_v60 }
 0x187   : > { %v2976_v38 = vpop.eup %2975  ;;  %3001 = vpow2.f32 %v2289_v35  ;;  %2531 = vmatpush3.xpose.msk.msra.mxu1 %vm1540_vm1, %v2970_v37  ;;  %2562 = vmatprep.mubr.msk.f32.mxu1 %vm1540_vm1, %v3488_v41  ;;  %v1346_v62 = vadd.f32 1.0, %v2974_v33  ;;  %v1016_v35 = vadd.f32 %v3818_v4, %v3753_v19  ;;  %v2310_v28 = vmul.f32 -1.442695, %v1021_v7 }
 0x188   : > { %v2314_v36 = vmul.f32 -1.442695, %v1041_v14  ;;  %v3795_v15 = vpop.eup %2977  ;;  %3003 = vpow2.f32 %v2315_v2  ;;  %2532 = vmatprep.subr.msk.mxu1 %vm1540_vm1, %v2976_v38  ;;  %v891_v59 = vadd.f32 %v3818_v4, %v3617_v18  ;;  %v1011_v19 = vadd.f32 %v3818_v4, %v3758_v50 }
 0x189   : > { %v2980_v3 = vpop.eup %2979  ;;  %3005 = vrcp.f32 %v1347_v55  ;;  %v2309_v2 = vmul.f32 -1.442695, %v1016_v35  ;;  %v1006_v30 = vadd.f32 %v3818_v4, %v3744_v53  ;;  %v1001_v53 = vadd.f32 %v3818_v4, %v3749_v42 }
 0x18a   : > { %v2982_v0 = vpop.eup %2981  ;;  %3007 = vpow2.f32 %v2314_v36  ;;  %v2284_v18 = vmul.f32 -1.442695, %v891_v59  ;;  %v2308_v50 = vmul.f32 -1.442695, %v1011_v19  ;;  %v1322_v59 = vadd.f32 1.0, %v3725_v10 }
 0x18b   : > { %v2984_v6 = vpop.eup %2983  ;;  %3009 = vrcp.f32 %v1331_v23  ;;  %2533 = vmatpush3.xpose.msk.msra.mxu1 %vm1540_vm1, %v2980_v3  ;;  %v1345_v45 = vadd.f32 1.0, %v2982_v0  ;;  %v1326_v0 = vadd.f32 1.0, %v3762_v58  ;;  %v2307_v52 = vmul.f32 -1.442695, %v1006_v30 }
 0x18c   : > { %v3802_v41 = vpop.eup %2985  ;;  %3011 = vpow2.f32 %v2313_v56  ;;  %2534 = vmatprep.subr.msk.mxu1 %vm1540_vm1, %v2984_v6  ;;  %v1325_v58 = vadd.f32 1.0, %v3774_v46  ;;  %v2306_v42 = vmul.f32 -1.442695, %v1001_v53  ;;  %v1321_v19 = vadd.f32 1.0, %v3731_v9 }
 0x18d   : > { %v2988_v24 = vpop.eup %2987  ;;  %3013 = vpow2.f32 %v2288_v61 }
 0x18e   : > { %v2990_v13 = vpop.eup %2989  ;;  %3015 = vrcp.f32 %v1346_v62 }
 0x18f   : > { %v2992_v51 = vpop.eup %2991  ;;  %3017 = vrcp.f32 %v1330_v1  ;;  %2535 = vmatpush3.xpose.msk.msra.mxu1 %vm1540_vm1, %v2988_v24  ;;  %v1344_v12 = vadd.f32 1.0, %v2990_v13 }
 0x190   : > { %v2994_v39 = vpop.eup %2993  ;;  %3019 = vpow2.f32 %v2312_v8  ;;  %2536 = vmatprep.subr.msk.mxu1 %vm1540_vm1, %v2992_v51  ;;  %v996_v51 = vadd.f32 %v3818_v4, %v3729_v16 }
 0x191   : > { %v2996_v44 = vpop.eup %2995  ;;  %3021 = vpow2.f32 %v2287_v11 }
 0x192   : > { %v2998_v22 = vpop.eup %2997  ;;  %3023 = vrcp.f32 %v1345_v45  ;;  %v2305_v16 = vmul.f32 -1.442695, %v996_v51 }
 0x193   : > { %v3000_v5 = vpop.eup %2999  ;;  %3025 = vrcp.f32 %v1329_v29  ;;  %2537 = vmatpush3.xpose.msk.msra.mxu1 %vm1540_vm1, %v2996_v44  ;;  %v1343_v40 = vadd.f32 1.0, %v2998_v22 }
 0x194   : > { %v3002_v37 = vpop.eup %3001  ;;  %3027 = vpow2.f32 %v2311_v27  ;;  %2538 = vmatprep.subr.msk.mxu1 %vm1540_vm1, %v3000_v5  ;;  %v1324_v27 = vadd.f32 1.0, %v3738_v21  ;;  %v1323_v5 = vadd.f32 1.0, %v3742_v47 }
 0x195   : > { %v3004_v48 = vpop.eup %3003  ;;  %3029 = vpow2.f32 %v2286_v20  ;;  %v1342_v36 = vadd.f32 1.0, %v3002_v37  ;;  %v991_v20 = vadd.f32 %v3818_v4, %v3736_v25 }
 0x196   : > { %v3006_v49 = vpop.eup %3005  ;;  %3031 = vrcp.f32 %v1344_v12  ;;  %v1368_v31 = vadd.f32 1.0, %v3004_v48 }
 0x197   : > { %v3008_v55 = vpop.eup %3007  ;;  %3033 = vpow2.f32 %v2310_v28  ;;  %2539 = vmatpush3.xpose.msk.msra.mxu1 %vm1540_vm1, %v2994_v39  ;;  %v2304_v37 = vmul.f32 -1.442695, %v991_v20 }
 0x198   : > { %v3010_v14 = vpop.eup %3009  ;;  %3035 = vrcp.f32 %v1368_v31  ;;  %v1367_v33 = vadd.f32 1.0, %v3008_v55  ;;  %2540 = vmatprep.subr.msk.mxu1 %vm1540_vm1, %v3006_v49 }
 0x199   : > { %v3012_v38 = vpop.eup %3011  ;;  %3037 = vpow2.f32 %v2285_v34 }
 0x19a   : > { %v3014_v23 = vpop.eup %3013  ;;  %3039 = vrcp.f32 %v1343_v40  ;;  %v1366_v43 = vadd.f32 1.0, %v3012_v38 }
 0x19b   : > { %v3016_v56 = vpop.eup %3015  ;;  %3041 = vpow2.f32 %v2309_v2  ;;  %2541 = vmatpush3.xpose.msk.msra.mxu1 %vm1540_vm1, %v3010_v14  ;;  %v1341_v6 = vadd.f32 1.0, %v3014_v23 }
 0x19c   : > { %v3018_v3 = vpop.eup %3017  ;;  %3043 = vrcp.f32 %v1367_v33  ;;  %2542 = vmatprep.subr.msk.mxu1 %vm1540_vm1, %v3016_v56 }
 0x19d   : > { %v3020_v61 = vpop.eup %3019  ;;  %3045 = vpow2.f32 %v2284_v18 }
 0x19e   : > { %v3022_v62 = vpop.eup %3021  ;;  %3047 = vrcp.f32 %v1342_v36  ;;  %v1365_v24 = vadd.f32 1.0, %v3020_v61 }
 0x19f   : > { %v3024_v1 = vpop.eup %3023  ;;  %3049 = vpow2.f32 %v2308_v50  ;;  %2543 = vmatpush3.xpose.msk.msra.mxu1 %vm1540_vm1, %v3018_v3  ;;  %v1340_v13 = vadd.f32 1.0, %v3022_v62 }
 0x1a0   : > { %v3026_v8 = vpop.eup %3025  ;;  %3051 = vrcp.f32 %v1366_v43  ;;  %2544 = vmatprep.subr.msk.mxu1 %vm1540_vm1, %v3024_v1 }
 0x1a1   : > { %v3028_v11 = vpop.eup %3027  ;;  %3053 = vrcp.f32 %v1326_v0 }
 0x1a2   : > { %v3030_v60 = vpop.eup %3029  ;;  %3055 = vrcp.f32 %v1341_v6  ;;  %v1364_v7 = vadd.f32 1.0, %v3028_v11 }
 0x1a3   : > { %v3032_v45 = vpop.eup %3031  ;;  %3057 = vpow2.f32 %v2307_v52  ;;  %2545 = vmatpush3.xpose.msk.msra.mxu1 %vm1540_vm1, %v3026_v8  ;;  %v1339_v44 = vadd.f32 1.0, %v3030_v60 }
 0x1a4   : > { %v3034_v29 = vpop.eup %3033  ;;  %3059 = vrcp.f32 %v1365_v24  ;;  %2546 = vmatprep.subr.msk.mxu1 %vm1540_vm1, %v3032_v45  ;;  %v3138_v45 = vld [vmem:[%s3948_s3] sm:$0x1] }
 0x1a5   : > { %v3036_v39 = vpop.eup %3035  ;;  %3061 = vrcp.f32 %v1325_v58  ;;  %v1363_v21 = vadd.f32 1.0, %v3034_v29 }
 0x1a6   : > { %v3038_v46 = vpop.eup %3037  ;;  %3063 = vrcp.f32 %v1340_v13  ;;  %2718 = vmatpush3.xpose.msk.msra.mxu0 %vm1540_vm1, %v3036_v39 }
 0x1a7   : > { %v3040_v32 = vpop.eup %3039  ;;  %3065 = vpow2.f32 %v2306_v42  ;;  %2547 = vmatpush3.xpose.msk.msra.mxu1 %vm1540_vm1, %v3795_v15  ;;  %2719 = vmatprep.subr.mxu0 %v3201_v17  ;;  %v1338_v28 = vadd.f32 1.0, %v3038_v46  ;;  %v986_v15 = vadd.f32 %v3818_v4, %v3713_v63 }
 0x1a8   : > { %v3042_v22 = vpop.eup %3041  ;;  %3067 = vrcp.f32 %v1364_v7  ;;  %2548 = vmatprep.subr.msk.mxu1 %vm1540_vm1, %v3040_v32 }
 0x1a9   : > { %v3044_v12 = vpop.eup %3043  ;;  %3069 = vrcp.f32 %v1324_v27  ;;  %v1362_v34 = vadd.f32 1.0, %v3042_v22  ;;  %v2303_v31 = vmul.f32 -1.442695, %v986_v15 }
 0x1aa   : > { %v3046_v35 = vpop.eup %3045  ;;  %3071 = vrcp.f32 %v1339_v44  ;;  %2720 = vmatpush3.xpose.msk.msra.mxu0 %vm1540_vm1, %v3044_v12 }
 0x1ab   : > { %v3048_v25 = vpop.eup %3047  ;;  %3073 = vpow2.f32 %v2305_v16  ;;  %2549 = vmatpush3.xpose.msk.msra.mxu1 %vm1540_vm1, %v3802_v41  ;;  %2721 = vmatprep.subr.mxu0 %v3201_v17  ;;  %v1337_v40 = vadd.f32 1.0, %v3046_v35  ;;  %v981_v41 = vadd.f32 %v3818_v4, %v3721_v26  ;;  %v976_v26 = vadd.f32 %v3818_v4, %v3695_v57 }
 0x1ac   : > { %v3050_v48 = vpop.eup %3049  ;;  %3075 = vrcp.f32 %v1363_v21  ;;  %2550 = vmatprep.subr.msk.mxu1 %vm1540_vm1, %v3048_v25  ;;  %v971_v57 = vadd.f32 %v3818_v4, %v3705_v54  ;;  %v1536_v21 = vlaneseq }
 0x1ad   : > { %v3052_v47 = vpop.eup %3051  ;;  %3077 = vrcp.f32 %v1323_v5  ;;  %v1361_v2 = vadd.f32 1.0, %v3050_v48  ;;  %v2302_v38 = vmul.f32 -1.442695, %v981_v41  ;;  %v2301_v30 = vmul.f32 -1.442695, %v976_v26 }
 0x1ae   : > { %v3054_v49 = vpop.eup %3053  ;;  %3079 = vrcp.f32 %v1338_v28  ;;  %2722 = vmatpush3.xpose.msk.msra.mxu0 %vm1540_vm1, %v3052_v47  ;;  %v2300_v62 = vmul.f32 -1.442695, %v971_v57  ;;  %v1537_v5 = vshrl.u32 %v1536_v21, 7  ;;  %vm2073_vm3 = vcmp.lt.s32.totalorder %v1536_v21, 640 }
 0x1af   : > { %v3056_v63 = vpop.eup %3055  ;;  %3081 = vpow2.f32 %v2304_v37  ;;  %2551 = vmatpush3.xpose.msk.msra.mxu1 %vm1540_vm1, %v3054_v49  ;;  %2723 = vmatprep.subr.mxu0 %v3201_v17 }
 0x1b0   : > { %v3058_v55 = vpop.eup %3057  ;;  %3083 = vrcp.f32 %v1362_v34  ;;  %2552 = vmatprep.subr.msk.mxu1 %vm1540_vm1, %v3056_v63  ;;  %v1538_v28 = vsub.s32 0, %v1537_v5 }
 0x1b1   : > { %v3060_v10 = vpop.eup %3059  ;;  %3085 = vrcp.f32 %v1322_v59  ;;  %v1360_v23 = vadd.f32 1.0, %v3058_v55 }
 0x1b2   : > { %v3062_v14 = vpop.eup %3061  ;;  %3087 = vrcp.f32 %v1337_v40  ;;  %2724 = vmatpush3.xpose.msk.msra.mxu0 %vm1540_vm1, %v3060_v10 }
 0x1b3   : > { %v3064_v33 = vpop.eup %3063  ;;  %3089 = vpow2.f32 %v2303_v31  ;;  %2553 = vmatpush3.xpose.msk.msra.mxu1 %vm1540_vm1, %v3062_v14  ;;  %2725 = vmatprep.subr.mxu0 %v3201_v17 }
 0x1b4   : > { %v3066_v18 = vpop.eup %3065  ;;  %3091 = vrcp.f32 %v1361_v2  ;;  %2554 = vmatprep.subr.msk.mxu1 %vm1540_vm1, %v3064_v33 }
 0x1b5   : > { %v3068_v9 = vpop.eup %3067  ;;  %3093 = vrcp.f32 %v1321_v19  ;;  %v1359_v3 = vadd.f32 1.0, %v3066_v18 }
 0x1b6   : > { %v3070_v36 = vpop.eup %3069  ;;  %2726 = vmatpush3.xpose.msk.msra.mxu0 %vm1540_vm1, %v3068_v9  ;;  %3095 = vpow2.f32 %v2302_v38 }
 0x1b7   : > { %v3072_v56 = vpop.eup %3071  ;;  %2555 = vmatpush3.xpose.msk.msra.mxu1 %vm1540_vm1, %v3070_v36  ;;  %2727 = vmatprep.subr.mxu0 %v3201_v17  ;;  %3097 = vrcp.f32 %v1360_v23 }
 0x1b8   : > { %v3074_v50 = vpop.eup %3073  ;;  %2556 = vmatprep.subr.msk.mxu1 %vm1540_vm1, %v3072_v56  ;;  %3099 = vpow2.f32 %v2301_v30  ;;  %v3204_v56 = vmov 1966171168  }
 0x1b9   : > { %v3076_v43 = vpop.eup %3075  ;;  %v1358_v4 = vadd.f32 1.0, %v3074_v50  ;;  %3101 = vrcp.f32 %v1359_v3  ;;  %v2034_v30 = vunpack.c.l.s4 %v3204_v56 }
 0x1ba   : > { %v3078_v61 = vpop.eup %3077  ;;  %2728 = vmatpush3.xpose.msk.msra.mxu0 %vm1540_vm1, %v3076_v43  ;;  %3103 = vpow2.f32 %v2300_v62 }
 0x1bb   : > { %v3080_v0 = vpop.eup %3079  ;;  %2557 = vmatpush3.xpose.msk.msra.mxu1 %vm1540_vm1, %v3078_v61  ;;  %2729 = vmatprep.subr.mxu0 %v3201_v17  ;;  %3105 = vrcp.f32 %v1358_v4  ;;  %v2035_v61 = vunpack.c.0.s8 %v2034_v30 }
 0x1bc   : > { %v3082_v54 = vpop.eup %3081  ;;  %2558 = vmatprep.subr.msk.mxu1 %vm1540_vm1, %v3080_v0 }
 0x1bd   : > { %v3084_v6 = vpop.eup %3083  ;;  %v1357_v8 = vadd.f32 1.0, %v3082_v54  ;;  %v2038_v54 = vsub.s32 %v2035_v61, %v1537_v5 }
 0x1be   : > { %v3086_v1 = vpop.eup %3085  ;;  %2730 = vmatpush3.xpose.msk.msra.mxu0 %vm1540_vm1, %v3084_v6 }
 0x1bf   : > { %v3088_v52 = vpop.eup %3087  ;;  %2559 = vmatpush3.xpose.msk.msra.mxu1 %vm1540_vm1, %v3086_v1  ;;  %2731 = vmatprep.subr.mxu0 %v3201_v17  ;;  %3107 = vrcp.f32 %v1357_v8 }
 0x1c0   : > { %v3090_v53 = vpop.eup %3089  ;;  %2560 = vmatprep.subr.msk.mxu1 %vm1540_vm1, %v3088_v52 }
 0x1c1   : > { %v3092_v24 = vpop.eup %3091  ;;  %v1356_v60 = vadd.f32 1.0, %v3090_v53 }
 0x1c2   : > { %v3094_v11 = vpop.eup %3093  ;;  %2732 = vmatpush3.xpose.msk.msra.mxu0 %vm1540_vm1, %v3092_v24 }
 0x1c3   : > { %2561 = vmatpush3.xpose.msk.msra.mxu1 %vm1540_vm1, %v3094_v11  ;;  %2733 = vmatprep.subr.mxu0 %v3201_v17  ;;  %v3096_v58 = vpop.eup %3095  ;;  %3109 = vrcp.f32 %v1356_v60 }
 0x1c4   : > { %v3098_v13 = vpop.eup %3097  ;;  %v1355_v42 = vadd.f32 1.0, %v3096_v58 }
 0x1c5   : > { %v3100_v51 = vpop.eup %3099 }
 0x1c6   : > { %2734 = vmatpush3.xpose.msk.msra.mxu0 %vm1540_vm1, %v3098_v13  ;;  %2563 = vmatmul.mubr.msk.f32.vlgmr.msra.gmra.mxu1 %vm1540_vm1, %v3138_v45  ;;  %v3102_v29 = vpop.eup %3101  ;;  %v1354_v39 = vadd.f32 1.0, %v3100_v51  ;;  %3111 = vrcp.f32 %v1355_v42 }
 0x1c7   : > { %2735 = vmatprep.subr.mxu0 %v3201_v17  ;;  %v3104_v7 = vpop.eup %3103 }
 0x1c8   : > { %v3106_v27 = vpop.eup %3105  ;;  %3113 = vrcp.f32 %v1354_v39  ;;  %v1353_v46 = vadd.f32 1.0, %v3104_v7 }
 0x1ca   : > { %2736 = vmatpush3.xpose.msk.msra.mxu0 %vm1540_vm1, %v3102_v29  ;;  %3115 = vrcp.f32 %v1353_v46 }
 0x1cb   : > { %2737 = vmatprep.subr.mxu0 %v3201_v17 }
 0x1cc   : > { %v3108_v44 = vpop.eup %3107 }
 0x1ce   : > { %2738 = vmatpush3.xpose.msk.msra.mxu0 %vm1540_vm1, %v3106_v27 }
 0x1cf   : > { %2739 = vmatprep.subr.mxu0 %v3201_v17 }
 0x1d0   : > { %v3110_v32 = vpop.eup %3109 }
 0x1d2   : > { %2740 = vmatpush3.xpose.msk.msra.mxu0 %vm1540_vm1, %v3108_v44 }
 0x1d3   : > { %2741 = vmatprep.subr.mxu0 %v3201_v17  ;;  %v3112_v16 = vpop.eup %3111 }
 0x1d5   : > { %v3114_v20 = vpop.eup %3113 }
 0x1d6   : > { %2742 = vmatpush3.xpose.msk.msra.mxu0 %vm1540_vm1, %v3110_v32 }
 0x1d7   : > { %2743 = vmatprep.subr.mxu0 %v3201_v17  ;;  %v3116_v22 = vpop.eup %3115  ;;  %v1534_v15 = vpop.permute.xlu0 %1533 }
 0x1d8   : > { %v1539_v37 = vrot.slane %v1534_v15, %v1538_v28 }
 0x1da   : > { %2744 = vmatpush3.xpose.msk.msra.mxu0 %vm1540_vm1, %v3112_v16 }
 0x1db   : > { %2745 = vmatprep.subr.mxu0 %v3201_v17 }
 0x1de   : > { %2746 = vmatpush3.xpose.msk.msra.mxu0 %vm1540_vm1, %v3114_v20 }
 0x1df   : > { %2747 = vmatprep.subr.mxu0 %v3201_v17 }
 0x1e2   : > { %2748 = vmatpush3.xpose.msk.msra.mxu0 %vm1540_vm1, %v3116_v22 }
 0x1e5   : > { %2750 = vmatmul.mubr.msk.f32.vlgmr.msra.gmra.mxu0 %vm1540_vm1, %v3138_v45 }
 0x246   : > { %v1850_v12 = vpop.f32.mrf.mxu1 }
 0x247   : > { %v1851_v59 = vadd.f32 %v1850_v12, %v1539_v37 }
 0x248   : > { %v1852_v35 = vpop.f32.mrf.mxu1 }
 0x249   : > { %v1853_v49 = vadd.f32 %v1852_v35, %v1539_v37  ;;  %v2399_v63 = vmul.f32 -1.442695, %v1851_v59 }
 0x24b   : > { %v2400_v31 = vmul.f32 -1.442695, %v1853_v49 }
 0x286   : > { %v1921_v25 = vpop.f32.mrf.mxu1 }
 0x287   : > { %v1922_v34 = vadd.f32 %v1921_v25, %v1539_v37 }
 0x288   : > { %v1923_v48 = vpop.f32.mrf.mxu1 }
 0x289   : > { %v1924_v47 = vadd.f32 %v1923_v48, %v1539_v37  ;;  %v2401_v40 = vmul.f32 -1.442695, %v1922_v34 }
 0x28b   : > { %v2402_v17 = vmul.f32 -1.442695, %v1924_v47  ;;  %3117 = vpow2.f32 %v2401_v40 }
 0x28d   : > { %3119 = vpow2.f32 %v2402_v17 }
 0x28e   : > { %3121 = vpow2.f32 %v2399_v63 }
 0x28f   : > { %3123 = vpow2.f32 %v2400_v31 }
 0x298   : > { %v3118_v55 = vpop.eup %3117 }
 0x299   : > { %v2013_v38 = vadd.f32 1.0, %v3118_v55 }
 0x29a   : > { %v3120_v10 = vpop.eup %3119 }
 0x29b   : > { %v3122_v14 = vpop.eup %3121  ;;  %v2014_v18 = vadd.f32 1.0, %v3120_v10 }
 0x29c   : > { %v3124_v26 = vpop.eup %3123  ;;  %v2011_v23 = vadd.f32 1.0, %v3122_v14 }
 0x29d   : > { %v2012_v9 = vadd.f32 1.0, %v3124_v26 }
 0x2a5   : > { %v1992_v41 = vpop.f32.mrf.mxu0 }
 0x2a6   : > { %v1993_v2 = vadd.f32 %v1992_v41, %v1539_v37 }
 0x2a7   : > { %v2751_v19 = vpop.f32.mrf.mxu0 }
 0x2a8   : > { %v2403_v33 = vmul.f32 -1.442695, %v1993_v2 }
 0x2aa   : > { %3125 = vpow2.f32 %v2403_v33 }
 0x2ab   : > { %3127 = vrcp.f32 %v2013_v38 }
 0x2ac   : > { %3129 = vrcp.f32 %v2014_v18 }
 0x2ad   : > { %3131 = vrcp.f32 %v2011_v23 }
 0x2ae   : > { %3133 = vrcp.f32 %v2012_v9 }
 0x2b7   : > { %v3126_v36 = vpop.eup %3125 }
 0x2b8   : > { %v2015_v57 = vadd.f32 1.0, %v3126_v36  ;;  %v3128_v50 = vpop.eup %3127 }
 0x2b9   : > { %v3130_v3 = vpop.eup %3129 }
 0x2ba   : > { %3135 = vrcp.f32 %v2015_v57  ;;  %v3132_v43 = vpop.eup %3131  ;;  %v2032_v62 = vcombine.low %v3128_v50, %v3130_v3 }
 0x2bb   : > { %v3134_v0 = vpop.eup %3133 }
 0x2bc   : > { %v2031_v4 = vcombine.low %v3132_v43, %v3134_v0  ;;  %v2046_v6 = vrot.slane %v2032_v62, %v2038_v54 }
 0x2be   : > { %v2039_v1 = vrot.slane %v2031_v4, %v2038_v54 }
 0x2c0   : > { %v2054_v52 = vcombine.low %v2039_v1, %v2046_v6 }
 0x2c2   : > { %v2061_v24 = vrot.slane %v2054_v52, %v2038_v54 }
 0x2c7   : > { %v3136_v53 = vpop.eup %3135 }
 0x2c8   : > { %v2053_v8 = vrot.slane %v3136_v53, %v2038_v54 }
 0x2ca   : > { %v2068_v11 = vrot.slane %v2053_v8, %v2038_v54 }
 0x2cc   : > { %v2069_v58 = vcombine.low %v2061_v24, %v2068_v11 }
 0x2ce   : > { %2075 = vst.msk [vmem:[%s232_s24] sm:$0x1f] %vm2073_vm3, %v2069_v58 }
 0x2cf   : > { %3152 = shalt.err (!%p3149_p3)
}
 0x2d0   : > { %s3153_s14 = scalar_lea.hbm %s2089_s7, 80  ;;  %s3157_s16 = scalar_lea.hbm %s3950_s5, 160 }
 0x2d1   : > { %p3154_p4 = scmp.ne.s32.totalorder %s2089_s7, %s3153_s14  ;;  %p3158_p9 = scmp.lt.s32.totalorder %s2089_s7, %s3950_s5 }
 0x2d2   : > { %p3159_p10 = scmp.lt.s32.totalorder %s3157_s16, %s3153_s14 }
 0x2d3   : > { %p3155_p7 = pnand %p3154_p4, %p3274_p5 }
 0x2d4   : > { %p3160_p11 = por %p3159_p10, %p3158_p9 }
 0x2d5   : > { %p3156_p8 = pneg %p3155_p7 }
 0x2d7   : > { %p3161_p12 = pnand %p3160_p11, %p3156_p8 }
 0x2d9   : > { %3164 = shalt.err (!%p3161_p12)
}
 0x2da   : > { %2753 = dma.vmem_to_hbm [thread:$0]  (%p3274_p5), %s2092_s26, 80, %s2089_s7, %s2077_s8  }
 0x2db PF: > { %p2759_p13 = scmp.ge.s32.totalorder %s3199_s23, 2  ;;  %s2103_s19 = sand.u32 1, %s3187_s20  }
 0x2dc   : > { %s2104_s4 = scalar_lea.sflag [#allocation4], %s2103_s19 }
 0x2dd   : > { %p2756_p0 = pnand %p2759_p13, %p3278_p6 }
 0x2df   : > { %p2757_p1 = pneg %p2756_p0 }
 0x2e1   : > { %3182 = dma.done.wait (%p2757_p1), %s2104_s4, 80  }
 0x2e2   : > { %3184 = vsyncadd (%p2757_p1), %s2104_s4, 4294967216  ;;  %p17_p2 = scmp.ge.s32.totalorder %s3262_s25, 4   ;;  %s3953_s20 = smov %s3191_s21 }
 0x2e3   : > { %s3954_s21 = smov %s3195_s22  ;;  %s3955_s22 = smov %s3272_s28 }
 0x2e4   : > { %s3956_s23 = smov %s3262_s25  ;;  %19 = sbr.rel (!%p17_p2) target bundleno = 6 (0x6), region = 75 }
 0x2e9   :  { %2109 = vsyncpa [#allocation4], 1 }
 0x2ea   :  { %2111 = vsyncpa [#allocation4 + $0x1], 1 }

</bundles_post_ra>
